<compile_context>
chip_gen: v5e
topology: v5e:2x2
jax: 0.10.0
libtpu: 0.0.40
codegen_flags: <defaults>
</compile_context>

<pallas_src>
import functools

import jax
import jax.numpy as jnp
from jax.experimental import pallas as pl
from jax.experimental.pallas import tpu as pltpu


def _round_up(x, m):
    return ((x + m - 1) // m) * m


def _pick_k_tile(kc):
    # Small contractions: take the whole thing in one k-step.
    if kc <= 2048:
        return kc
    for c in (512, 256, 128):
        if kc % c == 0:
            return c
    return kc


# ----------------------------- Pallas kernel --------------------------------
def _mm_bias_act_kernel(x_ref, w_ref, b_ref, o_ref, acc_ref, *, neg_slope):
    # x_ref: (tm, tk) bf16   w_ref: (tk, tn) bf16   b_ref: (1, tn) f32
    # o_ref: (tm, tn) bf16   acc_ref: (tm, tn) f32 scratch
    @pl.when(pl.program_id(2) == 0)
    def _():
        acc_ref[...] = jnp.zeros_like(acc_ref)

    acc_ref[...] += jnp.dot(x_ref[...], w_ref[...],
                            preferred_element_type=jnp.float32)

    @pl.when(pl.program_id(2) == pl.num_programs(2) - 1)
    def _():
        out = acc_ref[...] + b_ref[...]
        if neg_slope is not None:
            out = jnp.where(out >= 0.0, out, neg_slope * out)
        o_ref[...] = out.astype(o_ref.dtype)


def pallas_matmul_bias_act(x2d, w2d, b2d, neg_slope):
    """out[m, n] = act(sum_k x2d[m, k] * w2d[k, n] + b2d[0, n]).

    x2d: (M, Kc) bf16 (Kc = K*cin, real channels only),
    w2d: (Kc, Np) bf16 with Np % 128 == 0, b2d: (1, Np) f32.
    Returns (M, Np) bf16.
    """
    M, Kc = x2d.shape
    Kc2, Np = w2d.shape
    assert Kc == Kc2 and Np % 128 == 0

    tn = 256 if Np % 256 == 0 else 128     # match 256-wide MXU when possible
    tk = _pick_k_tile(Kc)
    tm = min(512, _round_up(M, 16))        # bf16 sublane packing -> mult. of 16
    # v7x megacore: if the N axis has a single block, try to give the M axis
    # at least 2 "parallel" blocks so both TensorCores get work.
    if Np // tn < 2:
        while tm > 16 and (_round_up(M, tm) // tm) < 2:
            tm = max(16, _round_up(tm // 2, 16))

    Mp = _round_up(M, tm)
    if Mp != M:
        x2d = jnp.pad(x2d, ((0, Mp - M), (0, 0)))

    grid = (Mp // tm, Np // tn, Kc // tk)
    kernel = functools.partial(_mm_bias_act_kernel, neg_slope=neg_slope)
    out = pl.pallas_call(
        kernel,
        out_shape=jax.ShapeDtypeStruct((Mp, Np), jnp.bfloat16),
        grid_spec=pltpu.PrefetchScalarGridSpec(
            num_scalar_prefetch=0,
            grid=grid,
            in_specs=[
                pl.BlockSpec((tm, tk), lambda i, j, k: (i, k)),
                pl.BlockSpec((tk, tn), lambda i, j, k: (k, j)),
                pl.BlockSpec((1, tn), lambda i, j, k: (0, j)),
            ],
            out_specs=pl.BlockSpec((tm, tn), lambda i, j, k: (i, j)),
            scratch_shapes=[pltpu.VMEM((tm, tn), jnp.float32)],
        ),
        compiler_params=pltpu.CompilerParams(
            dimension_semantics=("parallel", "parallel", "arbitrary"),
            vmem_limit_bytes=32 * 1024 * 1024),
    )(x2d, w2d, b2d)
    return out[:M]


# ---------------------- Conv2d with (K, 1) kernel (channel-last) -------------
def conv2d_kx1_channels_last(x, layer):
    """x: (Bc, H, W, C_any) bf16 (real channels in the low lanes).
    Returns (Bc, H_out, W, Cout_pad) bf16 with optional fused leaky_relu.
    PyTorch Conv2d(kernel=(K,1), stride=(s,1), pad=(p,0)) semantics."""
    K, stride, pad, cin = layer["K"], layer["stride"], layer["pad"], layer["cin"]
    Bc, H, W, _ = x.shape
    x = x[..., :cin]                                        # real channels only
    xp = jnp.pad(x, ((0, 0), (pad, pad), (0, 0), (0, 0)))
    Hp = H + 2 * pad
    H_out = (Hp - K) // stride + 1

    # im2col along H only: one concat along the channel axis, (k, c) row order
    # matching w2d.  TODO(synk): for the stride-1 layers the K-fold im2col
    # blow-up could be avoided by accumulating the taps in-kernel.
    cols = [xp[:, k: k + stride * (H_out - 1) + 1: stride, :, :] for k in range(K)]
    col = jnp.concatenate(cols, axis=-1)                    # (Bc, H_out, W, K*cin)
    x2d = col.reshape(Bc * H_out * W, K * cin)

    out2d = pallas_matmul_bias_act(x2d, layer["w2d"], layer["b2d"],
                                   layer["neg_slope"])      # (M, Cout_pad) bf16
    return out2d.reshape(Bc, H_out, W, layer["cout_pad"])


# ------------------------------ DiscriminatorP -------------------------------
def get_padding(kernel_size, dilation=1):
    return int((kernel_size * dilation - dilation) / 2)


def _prep_layer(w, bias, stride, pad, neg_slope):
    """Init-time weight prep: (Cout, Cin, K, 1) -> bf16 (K*Cin, Cout_pad)."""
    cout, cin, K, _ = w.shape
    cout_pad = _round_up(cout, 128)
    wt = jnp.transpose(w[..., 0], (2, 1, 0)).reshape(K * cin, cout)  # (k,c) rows
    w2d = jnp.zeros((K * cin, cout_pad), jnp.float32).at[:, :cout].set(wt)
    w2d = w2d.astype(jnp.bfloat16)
    b2d = jnp.zeros((1, cout_pad), jnp.float32).at[0, :cout].set(bias)
    return dict(w2d=w2d, b2d=b2d, K=K, stride=stride, pad=pad,
                neg_slope=neg_slope, cin=cin, cout=cout, cout_pad=cout_pad)


def init_discriminator_p_layers(key, d_mult):
    # NOTE: weight_norm / spectral_norm is a reparameterization; with fixed
    # synthetic weights the forward pass equals a plain Conv2d.
    chans = [1,
             int(32 * d_mult), int(128 * d_mult),
             int(512 * d_mult), int(1024 * d_mult), int(1024 * d_mult)]
    strides = [3, 3, 3, 3, 1]
    layers = []
    for i in range(5):
        key, kw, kb = jax.random.split(key, 3)
        cin, cout = chans[i], chans[i + 1]
        w = jax.random.normal(kw, (cout, cin, 5, 1), jnp.float32) * 0.05
        b = jax.random.normal(kb, (cout,), jnp.float32) * 0.05
        layers.append(_prep_layer(w, b, strides[i], get_padding(5, 1), 0.1))
    # conv_post: (3,1) kernel, stride 1, pad 1, no activation
    key, kw, kb = jax.random.split(key, 3)
    w = jax.random.normal(kw, (1, chans[5], 3, 1), jnp.float32) * 0.05
    b = jax.random.normal(kb, (1,), jnp.float32) * 0.05
    layers.append(_prep_layer(w, b, 1, 1, None))
    return layers


def discriminator_p_forward(layers, x, period):
    """x: (Bc, 1, T) f32.  Returns (flattened logits, fmap list in NCHW f32)."""
    b, c, t = x.shape
    if t % period != 0:
        n_pad = period - t % period
        x = jnp.pad(x, ((0, 0), (0, 0), (0, n_pad)), mode="reflect")
        t = t + n_pad
    # NCHW (b, 1, t//period, period) -> channel-last (b, H, W, 1) bf16
    x = x.reshape(b, c, t // period, period).transpose(0, 2, 3, 1)
    x = x.astype(jnp.bfloat16)

    fmap_cl = []
    for layer in layers:
        x = conv2d_kx1_channels_last(x, layer)     # conv (+leaky_relu) fused, bf16
        fmap_cl.append((x, layer["cout"]))         # keep channel-last along the chain

    # Boundary-only conversion for torch parity (NCHW, f32, padding stripped).
    fmap = [jnp.transpose(fm[..., :cout], (0, 3, 1, 2)).astype(jnp.float32)
            for fm, cout in fmap_cl]
    x_last = fmap[-1]                              # (b, 1, H_out, W)
    return x_last.reshape(b, -1), fmap             # torch.flatten(x, 1, -1)


# -------------------------- MultiPeriodDiscriminator --------------------------
def init_mpd_params(key, mpd_reshapes, d_mult):
    all_layers = []
    for _ in mpd_reshapes:
        key, sub = jax.random.split(key)
        all_layers.append(init_discriminator_p_layers(sub, d_mult))
    return all_layers


def multi_period_discriminator_forward(all_layers, mpd_reshapes, y, y_hat):
    B = y.shape[0]
    yy = jnp.concatenate([y, y_hat], axis=0)   # one pass / pallas_call per layer
    y_d_rs, y_d_gs, fmap_rs, fmap_gs = [], [], [], []
    for layers, period in zip(all_layers, mpd_reshapes):
        out, fmap = discriminator_p_forward(layers, yy, period)
        y_d_rs.append(out[:B])
        y_d_gs.append(out[B:])
        fmap_rs.append([f[:B] for f in fmap])
        fmap_gs.append([f[B:] for f in fmap])
    return y_d_rs, y_d_gs, fmap_rs, fmap_gs


if __name__ == "__main__":
    # Config (h): small, deterministic
    mpd_reshapes = [2, 3]
    discriminator_channel_mult = 0.125   # channels: 4, 16, 64, 128, 128
    # TODO(synk): use_spectral_norm=True path (spectral_norm) not reproduced;
    # forward with fixed synthetic weights is equivalent to a plain conv.

    key = jax.random.PRNGKey(0)
    k_params, k_y, k_yh = jax.random.split(key, 3)

    params = init_mpd_params(k_params, mpd_reshapes, discriminator_channel_mult)

    B, C, T = 2, 1, 64
    y = jax.random.normal(k_y, (B, C, T), jnp.float32)
    y_hat = jax.random.normal(k_yh, (B, C, T), jnp.float32)

    fwd = jax.jit(lambda a, b: multi_period_discriminator_forward(
        params, mpd_reshapes, a, b))
    out = fwd(y, y_hat)
    out = jax.block_until_ready(out)

    y_d_rs, y_d_gs, fmap_rs, fmap_gs = out
    assert len(y_d_rs) == len(mpd_reshapes)
    assert len(y_d_gs) == len(mpd_reshapes)
    assert len(fmap_rs[0]) == 6 and len(fmap_gs[0]) == 6
    assert y_d_rs[0].shape[0] == B and fmap_rs[0][0].shape[0] == B
    assert all(jnp.all(jnp.isfinite(o)) for o in y_d_rs + y_d_gs)
    print("KERNEL_OK")
</pallas_src>

<mosaic_0001>
module attributes {stable_mosaic.version = 11 : i64} {
  func.func @_mm_bias_act_kernel(%arg0: i32, %arg1: i32, %arg2: i32, %arg3: memref<48x5xbf16, #tpu.memory_space<vmem>>, %arg4: memref<5x128xbf16, #tpu.memory_space<vmem>>, %arg5: memref<1x128xf32, #tpu.memory_space<vmem>>, %arg6: memref<48x128xbf16, #tpu.memory_space<vmem>>, %arg7: memref<48x128xf32, #tpu.memory_space<vmem>>) attributes {dimension_semantics = [#tpu.dimension_semantics<parallel>, #tpu.dimension_semantics<parallel>, #tpu.dimension_semantics<arbitrary>], iteration_bounds = array<i64: 2, 1, 1>, scalar_prefetch = 0 : i64, scratch_operands = 1 : i64, tpu.core_type = #tpu.core_type<tc>, window_params = [{transform_indices = @transform_0, window_bounds = array<i64: 48, 5>}, {transform_indices = @transform_1, window_bounds = array<i64: 5, 128>}, {transform_indices = @transform_2, window_bounds = array<i64: 1, 128>}, {transform_indices = @transform_3, window_bounds = array<i64: 48, 128>}]} {
    %c0_i32 = arith.constant 0 : i32
    %0 = arith.cmpi eq, %arg2, %c0_i32 : i32
    %1 = arith.extui %0 : i1 to i32
    %c0_i32_0 = arith.constant 0 : i32
    %2 = arith.cmpi ne, %1, %c0_i32_0 : i32
    scf.if %2 {
      %cst_10 = arith.constant 0.000000e+00 : f32
      %12 = vector.broadcast %cst_10 : f32 to vector<48x128xf32>
      %c0_11 = arith.constant 0 : index
      %c0_12 = arith.constant 0 : index
      %13 = vector.load %arg7[%c0_11, %c0_12] : memref<48x128xf32, #tpu.memory_space<vmem>>, vector<48x128xf32>
      tpu.vector_store %arg7[%c0_11, %c0_12], %12 {strides = array<i32>} : memref<48x128xf32, #tpu.memory_space<vmem>>, vector<48x128xf32>,
    } else {
    }
    %c0 = arith.constant 0 : index
    %c0_1 = arith.constant 0 : index
    %3 = vector.load %arg7[%c0, %c0_1] : memref<48x128xf32, #tpu.memory_space<vmem>>, vector<48x128xf32>
    %c0_2 = arith.constant 0 : index
    %c0_3 = arith.constant 0 : index
    %4 = vector.load %arg3[%c0_2, %c0_3] : memref<48x5xbf16, #tpu.memory_space<vmem>>, vector<48x5xbf16>
    %c0_4 = arith.constant 0 : index
    %c0_5 = arith.constant 0 : index
    %5 = vector.load %arg4[%c0_4, %c0_5] : memref<5x128xbf16, #tpu.memory_space<vmem>>, vector<5x128xbf16>
    %cst = arith.constant dense<0.000000e+00> : vector<48x128xf32>
    %6 = tpu.matmul %4, %5, %cst {dimension_numbers = #tpu.dot_dimension_numbers<[1], [0], [0], [1], [0, 0, 1, 1], [], []>} : vector<48x5xbf16>, vector<5x128xbf16>, vector<48x128xf32> -> vector<48x128xf32>
    %7 = arith.addf %3, %6 : vector<48x128xf32>
    %c0_6 = arith.constant 0 : index
    %c0_7 = arith.constant 0 : index
    %8 = vector.load %arg7[%c0_6, %c0_7] : memref<48x128xf32, #tpu.memory_space<vmem>>, vector<48x128xf32>
    tpu.vector_store %arg7[%c0_6, %c0_7], %7 {strides = array<i32>} : memref<48x128xf32, #tpu.memory_space<vmem>>, vector<48x128xf32>,
    %c0_i32_8 = arith.constant 0 : i32
    %9 = arith.cmpi eq, %arg2, %c0_i32_8 : i32
    %10 = arith.extui %9 : i1 to i32
    %c0_i32_9 = arith.constant 0 : i32
    %11 = arith.cmpi ne, %10, %c0_i32_9 : i32
    scf.if %11 {
      %c0_10 = arith.constant 0 : index
      %c0_11 = arith.constant 0 : index
      %12 = vector.load %arg7[%c0_10, %c0_11] : memref<48x128xf32, #tpu.memory_space<vmem>>, vector<48x128xf32>
      %c0_12 = arith.constant 0 : index
      %c0_13 = arith.constant 0 : index
      %13 = vector.load %arg5[%c0_12, %c0_13] : memref<1x128xf32, #tpu.memory_space<vmem>>, vector<1x128xf32>
      %14 = vector.broadcast %13 : vector<1x128xf32> to vector<48x128xf32>
      %15 = arith.addf %12, %14 : vector<48x128xf32>
      %cst_14 = arith.constant 0.000000e+00 : f32
      %16 = vector.broadcast %cst_14 : f32 to vector<48x128xf32>
      %17 = arith.cmpf oge, %15, %16 : vector<48x128xf32>
      %cst_15 = arith.constant 1.000000e-01 : f32
      %18 = vector.broadcast %cst_15 : f32 to vector<48x128xf32>
      %19 = arith.mulf %18, %15 : vector<48x128xf32>
      %20 = arith.select %17, %15, %19 : vector<48x128xi1>, vector<48x128xf32>
      %21 = arith.truncf %20 : vector<48x128xf32> to vector<48x128xbf16>
      %c0_16 = arith.constant 0 : index
      %c0_17 = arith.constant 0 : index
      %22 = vector.load %arg6[%c0_16, %c0_17] : memref<48x128xbf16, #tpu.memory_space<vmem>>, vector<48x128xbf16>
      tpu.vector_store %arg6[%c0_16, %c0_17], %21 {strides = array<i32>} : memref<48x128xbf16, #tpu.memory_space<vmem>>, vector<48x128xbf16>,
    } else {
    }
    return
  }
  func.func @transform_0(%arg0: i32, %arg1: i32, %arg2: i32) -> (i32, i32) {
    %c0_i32 = arith.constant 0 : i32
    return %arg0, %arg2 : i32, i32
  }
  func.func @transform_1(%arg0: i32, %arg1: i32, %arg2: i32) -> (i32, i32) {
    %c0_i32 = arith.constant 0 : i32
    return %arg2, %arg1 : i32, i32
  }
  func.func @transform_2(%arg0: i32, %arg1: i32, %arg2: i32) -> (i32, i32) {
    %c0_i32 = arith.constant 0 : i32
    %c0_i32_0 = arith.constant 0 : i32
    return %c0_i32, %arg1 : i32, i32
  }
  func.func @transform_3(%arg0: i32, %arg1: i32, %arg2: i32) -> (i32, i32) {
    %c0_i32 = arith.constant 0 : i32
    return %arg0, %arg1 : i32, i32
  }
}

module attributes {stable_mosaic.version = 11 : i64} {
  func.func @_mm_bias_act_kernel(%arg0: i32, %arg1: i32, %arg2: i32, %arg3: memref<32x20xbf16, #tpu.memory_space<vmem>>, %arg4: memref<20x128xbf16, #tpu.memory_space<vmem>>, %arg5: memref<1x128xf32, #tpu.memory_space<vmem>>, %arg6: memref<32x128xbf16, #tpu.memory_space<vmem>>, %arg7: memref<32x128xf32, #tpu.memory_space<vmem>>) attributes {dimension_semantics = [#tpu.dimension_semantics<parallel>, #tpu.dimension_semantics<parallel>, #tpu.dimension_semantics<arbitrary>], iteration_bounds = array<i64: 2, 1, 1>, scalar_prefetch = 0 : i64, scratch_operands = 1 : i64, tpu.core_type = #tpu.core_type<tc>, window_params = [{transform_indices = @transform_0, window_bounds = array<i64: 32, 20>}, {transform_indices = @transform_1, window_bounds = array<i64: 20, 128>}, {transform_indices = @transform_2, window_bounds = array<i64: 1, 128>}, {transform_indices = @transform_3, window_bounds = array<i64: 32, 128>}]} {
    %c0_i32 = arith.constant 0 : i32
    %0 = arith.cmpi eq, %arg2, %c0_i32 : i32
    %1 = arith.extui %0 : i1 to i32
    %c0_i32_0 = arith.constant 0 : i32
    %2 = arith.cmpi ne, %1, %c0_i32_0 : i32
    scf.if %2 {
      %cst_10 = arith.constant 0.000000e+00 : f32
      %12 = vector.broadcast %cst_10 : f32 to vector<32x128xf32>
      %c0_11 = arith.constant 0 : index
      %c0_12 = arith.constant 0 : index
      %13 = vector.load %arg7[%c0_11, %c0_12] : memref<32x128xf32, #tpu.memory_space<vmem>>, vector<32x128xf32>
      tpu.vector_store %arg7[%c0_11, %c0_12], %12 {strides = array<i32>} : memref<32x128xf32, #tpu.memory_space<vmem>>, vector<32x128xf32>,
    } else {
    }
    %c0 = arith.constant 0 : index
    %c0_1 = arith.constant 0 : index
    %3 = vector.load %arg7[%c0, %c0_1] : memref<32x128xf32, #tpu.memory_space<vmem>>, vector<32x128xf32>
    %c0_2 = arith.constant 0 : index
    %c0_3 = arith.constant 0 : index
    %4 = vector.load %arg3[%c0_2, %c0_3] : memref<32x20xbf16, #tpu.memory_space<vmem>>, vector<32x20xbf16>
    %c0_4 = arith.constant 0 : index
    %c0_5 = arith.constant 0 : index
    %5 = vector.load %arg4[%c0_4, %c0_5] : memref<20x128xbf16, #tpu.memory_space<vmem>>, vector<20x128xbf16>
    %cst = arith.constant dense<0.000000e+00> : vector<32x128xf32>
    %6 = tpu.matmul %4, %5, %cst {dimension_numbers = #tpu.dot_dimension_numbers<[1], [0], [0], [1], [0, 0, 1, 1], [], []>} : vector<32x20xbf16>, vector<20x128xbf16>, vector<32x128xf32> -> vector<32x128xf32>
    %7 = arith.addf %3, %6 : vector<32x128xf32>
    %c0_6 = arith.constant 0 : index
    %c0_7 = arith.constant 0 : index
    %8 = vector.load %arg7[%c0_6, %c0_7] : memref<32x128xf32, #tpu.memory_space<vmem>>, vector<32x128xf32>
    tpu.vector_store %arg7[%c0_6, %c0_7], %7 {strides = array<i32>} : memref<32x128xf32, #tpu.memory_space<vmem>>, vector<32x128xf32>,
    %c0_i32_8 = arith.constant 0 : i32
    %9 = arith.cmpi eq, %arg2, %c0_i32_8 : i32
    %10 = arith.extui %9 : i1 to i32
    %c0_i32_9 = arith.constant 0 : i32
    %11 = arith.cmpi ne, %10, %c0_i32_9 : i32
    scf.if %11 {
      %c0_10 = arith.constant 0 : index
      %c0_11 = arith.constant 0 : index
      %12 = vector.load %arg7[%c0_10, %c0_11] : memref<32x128xf32, #tpu.memory_space<vmem>>, vector<32x128xf32>
      %c0_12 = arith.constant 0 : index
      %c0_13 = arith.constant 0 : index
      %13 = vector.load %arg5[%c0_12, %c0_13] : memref<1x128xf32, #tpu.memory_space<vmem>>, vector<1x128xf32>
      %14 = vector.broadcast %13 : vector<1x128xf32> to vector<32x128xf32>
      %15 = arith.addf %12, %14 : vector<32x128xf32>
      %cst_14 = arith.constant 0.000000e+00 : f32
      %16 = vector.broadcast %cst_14 : f32 to vector<32x128xf32>
      %17 = arith.cmpf oge, %15, %16 : vector<32x128xf32>
      %cst_15 = arith.constant 1.000000e-01 : f32
      %18 = vector.broadcast %cst_15 : f32 to vector<32x128xf32>
      %19 = arith.mulf %18, %15 : vector<32x128xf32>
      %20 = arith.select %17, %15, %19 : vector<32x128xi1>, vector<32x128xf32>
      %21 = arith.truncf %20 : vector<32x128xf32> to vector<32x128xbf16>
      %c0_16 = arith.constant 0 : index
      %c0_17 = arith.constant 0 : index
      %22 = vector.load %arg6[%c0_16, %c0_17] : memref<32x128xbf16, #tpu.memory_space<vmem>>, vector<32x128xbf16>
      tpu.vector_store %arg6[%c0_16, %c0_17], %21 {strides = array<i32>} : memref<32x128xbf16, #tpu.memory_space<vmem>>, vector<32x128xbf16>,
    } else {
    }
    return
  }
  func.func @transform_0(%arg0: i32, %arg1: i32, %arg2: i32) -> (i32, i32) {
    %c0_i32 = arith.constant 0 : i32
    return %arg0, %arg2 : i32, i32
  }
  func.func @transform_1(%arg0: i32, %arg1: i32, %arg2: i32) -> (i32, i32) {
    %c0_i32 = arith.constant 0 : i32
    return %arg2, %arg1 : i32, i32
  }
  func.func @transform_2(%arg0: i32, %arg1: i32, %arg2: i32) -> (i32, i32) {
    %c0_i32 = arith.constant 0 : i32
    %c0_i32_0 = arith.constant 0 : i32
    return %c0_i32, %arg1 : i32, i32
  }
  func.func @transform_3(%arg0: i32, %arg1: i32, %arg2: i32) -> (i32, i32) {
    %c0_i32 = arith.constant 0 : i32
    return %arg0, %arg1 : i32, i32
  }
}

module attributes {stable_mosaic.version = 11 : i64} {
  func.func @_mm_bias_act_kernel(%arg0: i32, %arg1: i32, %arg2: i32, %arg3: memref<16x80xbf16, #tpu.memory_space<vmem>>, %arg4: memref<80x128xbf16, #tpu.memory_space<vmem>>, %arg5: memref<1x128xf32, #tpu.memory_space<vmem>>, %arg6: memref<16x128xbf16, #tpu.memory_space<vmem>>, %arg7: memref<16x128xf32, #tpu.memory_space<vmem>>) attributes {dimension_semantics = [#tpu.dimension_semantics<parallel>, #tpu.dimension_semantics<parallel>, #tpu.dimension_semantics<arbitrary>], iteration_bounds = array<i64: 1, 1, 1>, scalar_prefetch = 0 : i64, scratch_operands = 1 : i64, tpu.core_type = #tpu.core_type<tc>, window_params = [{transform_indices = @transform_0, window_bounds = array<i64: 16, 80>}, {transform_indices = @transform_1, window_bounds = array<i64: 80, 128>}, {transform_indices = @transform_2, window_bounds = array<i64: 1, 128>}, {transform_indices = @transform_3, window_bounds = array<i64: 16, 128>}]} {
    %c0_i32 = arith.constant 0 : i32
    %0 = arith.cmpi eq, %arg2, %c0_i32 : i32
    %1 = arith.extui %0 : i1 to i32
    %c0_i32_0 = arith.constant 0 : i32
    %2 = arith.cmpi ne, %1, %c0_i32_0 : i32
    scf.if %2 {
      %cst_10 = arith.constant 0.000000e+00 : f32
      %12 = vector.broadcast %cst_10 : f32 to vector<16x128xf32>
      %c0_11 = arith.constant 0 : index
      %c0_12 = arith.constant 0 : index
      %13 = vector.load %arg7[%c0_11, %c0_12] : memref<16x128xf32, #tpu.memory_space<vmem>>, vector<16x128xf32>
      tpu.vector_store %arg7[%c0_11, %c0_12], %12 {strides = array<i32>} : memref<16x128xf32, #tpu.memory_space<vmem>>, vector<16x128xf32>,
    } else {
    }
    %c0 = arith.constant 0 : index
    %c0_1 = arith.constant 0 : index
    %3 = vector.load %arg7[%c0, %c0_1] : memref<16x128xf32, #tpu.memory_space<vmem>>, vector<16x128xf32>
    %c0_2 = arith.constant 0 : index
    %c0_3 = arith.constant 0 : index
    %4 = vector.load %arg3[%c0_2, %c0_3] : memref<16x80xbf16, #tpu.memory_space<vmem>>, vector<16x80xbf16>
    %c0_4 = arith.constant 0 : index
    %c0_5 = arith.constant 0 : index
    %5 = vector.load %arg4[%c0_4, %c0_5] : memref<80x128xbf16, #tpu.memory_space<vmem>>, vector<80x128xbf16>
    %cst = arith.constant dense<0.000000e+00> : vector<16x128xf32>
    %6 = tpu.matmul %4, %5, %cst {dimension_numbers = #tpu.dot_dimension_numbers<[1], [0], [0], [1], [0, 0, 1, 1], [], []>} : vector<16x80xbf16>, vector<80x128xbf16>, vector<16x128xf32> -> vector<16x128xf32>
    %7 = arith.addf %3, %6 : vector<16x128xf32>
    %c0_6 = arith.constant 0 : index
    %c0_7 = arith.constant 0 : index
    %8 = vector.load %arg7[%c0_6, %c0_7] : memref<16x128xf32, #tpu.memory_space<vmem>>, vector<16x128xf32>
    tpu.vector_store %arg7[%c0_6, %c0_7], %7 {strides = array<i32>} : memref<16x128xf32, #tpu.memory_space<vmem>>, vector<16x128xf32>,
    %c0_i32_8 = arith.constant 0 : i32
    %9 = arith.cmpi eq, %arg2, %c0_i32_8 : i32
    %10 = arith.extui %9 : i1 to i32
    %c0_i32_9 = arith.constant 0 : i32
    %11 = arith.cmpi ne, %10, %c0_i32_9 : i32
    scf.if %11 {
      %c0_10 = arith.constant 0 : index
      %c0_11 = arith.constant 0 : index
      %12 = vector.load %arg7[%c0_10, %c0_11] : memref<16x128xf32, #tpu.memory_space<vmem>>, vector<16x128xf32>
      %c0_12 = arith.constant 0 : index
      %c0_13 = arith.constant 0 : index
      %13 = vector.load %arg5[%c0_12, %c0_13] : memref<1x128xf32, #tpu.memory_space<vmem>>, vector<1x128xf32>
      %14 = vector.broadcast %13 : vector<1x128xf32> to vector<16x128xf32>
      %15 = arith.addf %12, %14 : vector<16x128xf32>
      %cst_14 = arith.constant 0.000000e+00 : f32
      %16 = vector.broadcast %cst_14 : f32 to vector<16x128xf32>
      %17 = arith.cmpf oge, %15, %16 : vector<16x128xf32>
      %cst_15 = arith.constant 1.000000e-01 : f32
      %18 = vector.broadcast %cst_15 : f32 to vector<16x128xf32>
      %19 = arith.mulf %18, %15 : vector<16x128xf32>
      %20 = arith.select %17, %15, %19 : vector<16x128xi1>, vector<16x128xf32>
      %21 = arith.truncf %20 : vector<16x128xf32> to vector<16x128xbf16>
      %c0_16 = arith.constant 0 : index
      %c0_17 = arith.constant 0 : index
      %22 = vector.load %arg6[%c0_16, %c0_17] : memref<16x128xbf16, #tpu.memory_space<vmem>>, vector<16x128xbf16>
      tpu.vector_store %arg6[%c0_16, %c0_17], %21 {strides = array<i32>} : memref<16x128xbf16, #tpu.memory_space<vmem>>, vector<16x128xbf16>,
    } else {
    }
    return
  }
  func.func @transform_0(%arg0: i32, %arg1: i32, %arg2: i32) -> (i32, i32) {
    %c0_i32 = arith.constant 0 : i32
    return %arg0, %arg2 : i32, i32
  }
  func.func @transform_1(%arg0: i32, %arg1: i32, %arg2: i32) -> (i32, i32) {
    %c0_i32 = arith.constant 0 : i32
    return %arg2, %arg1 : i32, i32
  }
  func.func @transform_2(%arg0: i32, %arg1: i32, %arg2: i32) -> (i32, i32) {
    %c0_i32 = arith.constant 0 : i32
    %c0_i32_0 = arith.constant 0 : i32
    return %c0_i32, %arg1 : i32, i32
  }
  func.func @transform_3(%arg0: i32, %arg1: i32, %arg2: i32) -> (i32, i32) {
    %c0_i32 = arith.constant 0 : i32
    return %arg0, %arg1 : i32, i32
  }
}

module attributes {stable_mosaic.version = 11 : i64} {
  func.func @_mm_bias_act_kernel(%arg0: i32, %arg1: i32, %arg2: i32, %arg3: memref<16x320xbf16, #tpu.memory_space<vmem>>, %arg4: memref<320x128xbf16, #tpu.memory_space<vmem>>, %arg5: memref<1x128xf32, #tpu.memory_space<vmem>>, %arg6: memref<16x128xbf16, #tpu.memory_space<vmem>>, %arg7: memref<16x128xf32, #tpu.memory_space<vmem>>) attributes {dimension_semantics = [#tpu.dimension_semantics<parallel>, #tpu.dimension_semantics<parallel>, #tpu.dimension_semantics<arbitrary>], iteration_bounds = array<i64: 1, 1, 1>, scalar_prefetch = 0 : i64, scratch_operands = 1 : i64, tpu.core_type = #tpu.core_type<tc>, window_params = [{transform_indices = @transform_0, window_bounds = array<i64: 16, 320>}, {transform_indices = @transform_1, window_bounds = array<i64: 320, 128>}, {transform_indices = @transform_2, window_bounds = array<i64: 1, 128>}, {transform_indices = @transform_3, window_bounds = array<i64: 16, 128>}]} {
    %c0_i32 = arith.constant 0 : i32
    %0 = arith.cmpi eq, %arg2, %c0_i32 : i32
    %1 = arith.extui %0 : i1 to i32
    %c0_i32_0 = arith.constant 0 : i32
    %2 = arith.cmpi ne, %1, %c0_i32_0 : i32
    scf.if %2 {
      %cst_10 = arith.constant 0.000000e+00 : f32
      %12 = vector.broadcast %cst_10 : f32 to vector<16x128xf32>
      %c0_11 = arith.constant 0 : index
      %c0_12 = arith.constant 0 : index
      %13 = vector.load %arg7[%c0_11, %c0_12] : memref<16x128xf32, #tpu.memory_space<vmem>>, vector<16x128xf32>
      tpu.vector_store %arg7[%c0_11, %c0_12], %12 {strides = array<i32>} : memref<16x128xf32, #tpu.memory_space<vmem>>, vector<16x128xf32>,
    } else {
    }
    %c0 = arith.constant 0 : index
    %c0_1 = arith.constant 0 : index
    %3 = vector.load %arg7[%c0, %c0_1] : memref<16x128xf32, #tpu.memory_space<vmem>>, vector<16x128xf32>
    %c0_2 = arith.constant 0 : index
    %c0_3 = arith.constant 0 : index
    %4 = vector.load %arg3[%c0_2, %c0_3] : memref<16x320xbf16, #tpu.memory_space<vmem>>, vector<16x320xbf16>
    %c0_4 = arith.constant 0 : index
    %c0_5 = arith.constant 0 : index
    %5 = vector.load %arg4[%c0_4, %c0_5] : memref<320x128xbf16, #tpu.memory_space<vmem>>, vector<320x128xbf16>
    %cst = arith.constant dense<0.000000e+00> : vector<16x128xf32>
    %6 = tpu.matmul %4, %5, %cst {dimension_numbers = #tpu.dot_dimension_numbers<[1], [0], [0], [1], [0, 0, 1, 1], [], []>} : vector<16x320xbf16>, vector<320x128xbf16>, vector<16x128xf32> -> vector<16x128xf32>
    %7 = arith.addf %3, %6 : vector<16x128xf32>
    %c0_6 = arith.constant 0 : index
    %c0_7 = arith.constant 0 : index
    %8 = vector.load %arg7[%c0_6, %c0_7] : memref<16x128xf32, #tpu.memory_space<vmem>>, vector<16x128xf32>
    tpu.vector_store %arg7[%c0_6, %c0_7], %7 {strides = array<i32>} : memref<16x128xf32, #tpu.memory_space<vmem>>, vector<16x128xf32>,
    %c0_i32_8 = arith.constant 0 : i32
    %9 = arith.cmpi eq, %arg2, %c0_i32_8 : i32
    %10 = arith.extui %9 : i1 to i32
    %c0_i32_9 = arith.constant 0 : i32
    %11 = arith.cmpi ne, %10, %c0_i32_9 : i32
    scf.if %11 {
      %c0_10 = arith.constant 0 : index
      %c0_11 = arith.constant 0 : index
      %12 = vector.load %arg7[%c0_10, %c0_11] : memref<16x128xf32, #tpu.memory_space<vmem>>, vector<16x128xf32>
      %c0_12 = arith.constant 0 : index
      %c0_13 = arith.constant 0 : index
      %13 = vector.load %arg5[%c0_12, %c0_13] : memref<1x128xf32, #tpu.memory_space<vmem>>, vector<1x128xf32>
      %14 = vector.broadcast %13 : vector<1x128xf32> to vector<16x128xf32>
      %15 = arith.addf %12, %14 : vector<16x128xf32>
      %cst_14 = arith.constant 0.000000e+00 : f32
      %16 = vector.broadcast %cst_14 : f32 to vector<16x128xf32>
      %17 = arith.cmpf oge, %15, %16 : vector<16x128xf32>
      %cst_15 = arith.constant 1.000000e-01 : f32
      %18 = vector.broadcast %cst_15 : f32 to vector<16x128xf32>
      %19 = arith.mulf %18, %15 : vector<16x128xf32>
      %20 = arith.select %17, %15, %19 : vector<16x128xi1>, vector<16x128xf32>
      %21 = arith.truncf %20 : vector<16x128xf32> to vector<16x128xbf16>
      %c0_16 = arith.constant 0 : index
      %c0_17 = arith.constant 0 : index
      %22 = vector.load %arg6[%c0_16, %c0_17] : memref<16x128xbf16, #tpu.memory_space<vmem>>, vector<16x128xbf16>
      tpu.vector_store %arg6[%c0_16, %c0_17], %21 {strides = array<i32>} : memref<16x128xbf16, #tpu.memory_space<vmem>>, vector<16x128xbf16>,
    } else {
    }
    return
  }
  func.func @transform_0(%arg0: i32, %arg1: i32, %arg2: i32) -> (i32, i32) {
    %c0_i32 = arith.constant 0 : i32
    return %arg0, %arg2 : i32, i32
  }
  func.func @transform_1(%arg0: i32, %arg1: i32, %arg2: i32) -> (i32, i32) {
    %c0_i32 = arith.constant 0 : i32
    return %arg2, %arg1 : i32, i32
  }
  func.func @transform_2(%arg0: i32, %arg1: i32, %arg2: i32) -> (i32, i32) {
    %c0_i32 = arith.constant 0 : i32
    %c0_i32_0 = arith.constant 0 : i32
    return %c0_i32, %arg1 : i32, i32
  }
  func.func @transform_3(%arg0: i32, %arg1: i32, %arg2: i32) -> (i32, i32) {
    %c0_i32 = arith.constant 0 : i32
    return %arg0, %arg1 : i32, i32
  }
}

module attributes {stable_mosaic.version = 11 : i64} {
  func.func @_mm_bias_act_kernel(%arg0: i32, %arg1: i32, %arg2: i32, %arg3: memref<16x384xbf16, #tpu.memory_space<vmem>>, %arg4: memref<384x128xbf16, #tpu.memory_space<vmem>>, %arg5: memref<1x128xf32, #tpu.memory_space<vmem>>, %arg6: memref<16x128xbf16, #tpu.memory_space<vmem>>, %arg7: memref<16x128xf32, #tpu.memory_space<vmem>>) attributes {dimension_semantics = [#tpu.dimension_semantics<parallel>, #tpu.dimension_semantics<parallel>, #tpu.dimension_semantics<arbitrary>], iteration_bounds = array<i64: 1, 1, 1>, scalar_prefetch = 0 : i64, scratch_operands = 1 : i64, tpu.core_type = #tpu.core_type<tc>, window_params = [{transform_indices = @transform_0, window_bounds = array<i64: 16, 384>}, {transform_indices = @transform_1, window_bounds = array<i64: 384, 128>}, {transform_indices = @transform_2, window_bounds = array<i64: 1, 128>}, {transform_indices = @transform_3, window_bounds = array<i64: 16, 128>}]} {
    %c0_i32 = arith.constant 0 : i32
    %0 = arith.cmpi eq, %arg2, %c0_i32 : i32
    %1 = arith.extui %0 : i1 to i32
    %c0_i32_0 = arith.constant 0 : i32
    %2 = arith.cmpi ne, %1, %c0_i32_0 : i32
    scf.if %2 {
      %cst_10 = arith.constant 0.000000e+00 : f32
      %12 = vector.broadcast %cst_10 : f32 to vector<16x128xf32>
      %c0_11 = arith.constant 0 : index
      %c0_12 = arith.constant 0 : index
      %13 = vector.load %arg7[%c0_11, %c0_12] : memref<16x128xf32, #tpu.memory_space<vmem>>, vector<16x128xf32>
      tpu.vector_store %arg7[%c0_11, %c0_12], %12 {strides = array<i32>} : memref<16x128xf32, #tpu.memory_space<vmem>>, vector<16x128xf32>,
    } else {
    }
    %c0 = arith.constant 0 : index
    %c0_1 = arith.constant 0 : index
    %3 = vector.load %arg7[%c0, %c0_1] : memref<16x128xf32, #tpu.memory_space<vmem>>, vector<16x128xf32>
    %c0_2 = arith.constant 0 : index
    %c0_3 = arith.constant 0 : index
    %4 = vector.load %arg3[%c0_2, %c0_3] : memref<16x384xbf16, #tpu.memory_space<vmem>>, vector<16x384xbf16>
    %c0_4 = arith.constant 0 : index
    %c0_5 = arith.constant 0 : index
    %5 = vector.load %arg4[%c0_4, %c0_5] : memref<384x128xbf16, #tpu.memory_space<vmem>>, vector<384x128xbf16>
    %cst = arith.constant dense<0.000000e+00> : vector<16x128xf32>
    %6 = tpu.matmul %4, %5, %cst {dimension_numbers = #tpu.dot_dimension_numbers<[1], [0], [0], [1], [0, 0, 1, 1], [], []>} : vector<16x384xbf16>, vector<384x128xbf16>, vector<16x128xf32> -> vector<16x128xf32>
    %7 = arith.addf %3, %6 : vector<16x128xf32>
    %c0_6 = arith.constant 0 : index
    %c0_7 = arith.constant 0 : index
    %8 = vector.load %arg7[%c0_6, %c0_7] : memref<16x128xf32, #tpu.memory_space<vmem>>, vector<16x128xf32>
    tpu.vector_store %arg7[%c0_6, %c0_7], %7 {strides = array<i32>} : memref<16x128xf32, #tpu.memory_space<vmem>>, vector<16x128xf32>,
    %c0_i32_8 = arith.constant 0 : i32
    %9 = arith.cmpi eq, %arg2, %c0_i32_8 : i32
    %10 = arith.extui %9 : i1 to i32
    %c0_i32_9 = arith.constant 0 : i32
    %11 = arith.cmpi ne, %10, %c0_i32_9 : i32
    scf.if %11 {
      %c0_10 = arith.constant 0 : index
      %c0_11 = arith.constant 0 : index
      %12 = vector.load %arg7[%c0_10, %c0_11] : memref<16x128xf32, #tpu.memory_space<vmem>>, vector<16x128xf32>
      %c0_12 = arith.constant 0 : index
      %c0_13 = arith.constant 0 : index
      %13 = vector.load %arg5[%c0_12, %c0_13] : memref<1x128xf32, #tpu.memory_space<vmem>>, vector<1x128xf32>
      %14 = vector.broadcast %13 : vector<1x128xf32> to vector<16x128xf32>
      %15 = arith.addf %12, %14 : vector<16x128xf32>
      %16 = arith.truncf %15 : vector<16x128xf32> to vector<16x128xbf16>
      %c0_14 = arith.constant 0 : index
      %c0_15 = arith.constant 0 : index
      %17 = vector.load %arg6[%c0_14, %c0_15] : memref<16x128xbf16, #tpu.memory_space<vmem>>, vector<16x128xbf16>
      tpu.vector_store %arg6[%c0_14, %c0_15], %16 {strides = array<i32>} : memref<16x128xbf16, #tpu.memory_space<vmem>>, vector<16x128xbf16>,
    } else {
    }
    return
  }
  func.func @transform_0(%arg0: i32, %arg1: i32, %arg2: i32) -> (i32, i32) {
    %c0_i32 = arith.constant 0 : i32
    return %arg0, %arg2 : i32, i32
  }
  func.func @transform_1(%arg0: i32, %arg1: i32, %arg2: i32) -> (i32, i32) {
    %c0_i32 = arith.constant 0 : i32
    return %arg2, %arg1 : i32, i32
  }
  func.func @transform_2(%arg0: i32, %arg1: i32, %arg2: i32) -> (i32, i32) {
    %c0_i32 = arith.constant 0 : i32
    %c0_i32_0 = arith.constant 0 : i32
    return %c0_i32, %arg1 : i32, i32
  }
  func.func @transform_3(%arg0: i32, %arg1: i32, %arg2: i32) -> (i32, i32) {
    %c0_i32 = arith.constant 0 : i32
    return %arg0, %arg1 : i32, i32
  }
}

module attributes {stable_mosaic.version = 11 : i64} {
  func.func @_mm_bias_act_kernel(%arg0: i32, %arg1: i32, %arg2: i32, %arg3: memref<16x640xbf16, #tpu.memory_space<vmem>>, %arg4: memref<640x128xbf16, #tpu.memory_space<vmem>>, %arg5: memref<1x128xf32, #tpu.memory_space<vmem>>, %arg6: memref<16x128xbf16, #tpu.memory_space<vmem>>, %arg7: memref<16x128xf32, #tpu.memory_space<vmem>>) attributes {dimension_semantics = [#tpu.dimension_semantics<parallel>, #tpu.dimension_semantics<parallel>, #tpu.dimension_semantics<arbitrary>], iteration_bounds = array<i64: 1, 1, 1>, scalar_prefetch = 0 : i64, scratch_operands = 1 : i64, tpu.core_type = #tpu.core_type<tc>, window_params = [{transform_indices = @transform_0, window_bounds = array<i64: 16, 640>}, {transform_indices = @transform_1, window_bounds = array<i64: 640, 128>}, {transform_indices = @transform_2, window_bounds = array<i64: 1, 128>}, {transform_indices = @transform_3, window_bounds = array<i64: 16, 128>}]} {
    %c0_i32 = arith.constant 0 : i32
    %0 = arith.cmpi eq, %arg2, %c0_i32 : i32
    %1 = arith.extui %0 : i1 to i32
    %c0_i32_0 = arith.constant 0 : i32
    %2 = arith.cmpi ne, %1, %c0_i32_0 : i32
    scf.if %2 {
      %cst_10 = arith.constant 0.000000e+00 : f32
      %12 = vector.broadcast %cst_10 : f32 to vector<16x128xf32>
      %c0_11 = arith.constant 0 : index
      %c0_12 = arith.constant 0 : index
      %13 = vector.load %arg7[%c0_11, %c0_12] : memref<16x128xf32, #tpu.memory_space<vmem>>, vector<16x128xf32>
      tpu.vector_store %arg7[%c0_11, %c0_12], %12 {strides = array<i32>} : memref<16x128xf32, #tpu.memory_space<vmem>>, vector<16x128xf32>,
    } else {
    }
    %c0 = arith.constant 0 : index
    %c0_1 = arith.constant 0 : index
    %3 = vector.load %arg7[%c0, %c0_1] : memref<16x128xf32, #tpu.memory_space<vmem>>, vector<16x128xf32>
    %c0_2 = arith.constant 0 : index
    %c0_3 = arith.constant 0 : index
    %4 = vector.load %arg3[%c0_2, %c0_3] : memref<16x640xbf16, #tpu.memory_space<vmem>>, vector<16x640xbf16>
    %c0_4 = arith.constant 0 : index
    %c0_5 = arith.constant 0 : index
    %5 = vector.load %arg4[%c0_4, %c0_5] : memref<640x128xbf16, #tpu.memory_space<vmem>>, vector<640x128xbf16>
    %cst = arith.constant dense<0.000000e+00> : vector<16x128xf32>
    %6 = tpu.matmul %4, %5, %cst {dimension_numbers = #tpu.dot_dimension_numbers<[1], [0], [0], [1], [0, 0, 1, 1], [], []>} : vector<16x640xbf16>, vector<640x128xbf16>, vector<16x128xf32> -> vector<16x128xf32>
    %7 = arith.addf %3, %6 : vector<16x128xf32>
    %c0_6 = arith.constant 0 : index
    %c0_7 = arith.constant 0 : index
    %8 = vector.load %arg7[%c0_6, %c0_7] : memref<16x128xf32, #tpu.memory_space<vmem>>, vector<16x128xf32>
    tpu.vector_store %arg7[%c0_6, %c0_7], %7 {strides = array<i32>} : memref<16x128xf32, #tpu.memory_space<vmem>>, vector<16x128xf32>,
    %c0_i32_8 = arith.constant 0 : i32
    %9 = arith.cmpi eq, %arg2, %c0_i32_8 : i32
    %10 = arith.extui %9 : i1 to i32
    %c0_i32_9 = arith.constant 0 : i32
    %11 = arith.cmpi ne, %10, %c0_i32_9 : i32
    scf.if %11 {
      %c0_10 = arith.constant 0 : index
      %c0_11 = arith.constant 0 : index
      %12 = vector.load %arg7[%c0_10, %c0_11] : memref<16x128xf32, #tpu.memory_space<vmem>>, vector<16x128xf32>
      %c0_12 = arith.constant 0 : index
      %c0_13 = arith.constant 0 : index
      %13 = vector.load %arg5[%c0_12, %c0_13] : memref<1x128xf32, #tpu.memory_space<vmem>>, vector<1x128xf32>
      %14 = vector.broadcast %13 : vector<1x128xf32> to vector<16x128xf32>
      %15 = arith.addf %12, %14 : vector<16x128xf32>
      %cst_14 = arith.constant 0.000000e+00 : f32
      %16 = vector.broadcast %cst_14 : f32 to vector<16x128xf32>
      %17 = arith.cmpf oge, %15, %16 : vector<16x128xf32>
      %cst_15 = arith.constant 1.000000e-01 : f32
      %18 = vector.broadcast %cst_15 : f32 to vector<16x128xf32>
      %19 = arith.mulf %18, %15 : vector<16x128xf32>
      %20 = arith.select %17, %15, %19 : vector<16x128xi1>, vector<16x128xf32>
      %21 = arith.truncf %20 : vector<16x128xf32> to vector<16x128xbf16>
      %c0_16 = arith.constant 0 : index
      %c0_17 = arith.constant 0 : index
      %22 = vector.load %arg6[%c0_16, %c0_17] : memref<16x128xbf16, #tpu.memory_space<vmem>>, vector<16x128xbf16>
      tpu.vector_store %arg6[%c0_16, %c0_17], %21 {strides = array<i32>} : memref<16x128xbf16, #tpu.memory_space<vmem>>, vector<16x128xbf16>,
    } else {
    }
    return
  }
  func.func @transform_0(%arg0: i32, %arg1: i32, %arg2: i32) -> (i32, i32) {
    %c0_i32 = arith.constant 0 : i32
    return %arg0, %arg2 : i32, i32
  }
  func.func @transform_1(%arg0: i32, %arg1: i32, %arg2: i32) -> (i32, i32) {
    %c0_i32 = arith.constant 0 : i32
    return %arg2, %arg1 : i32, i32
  }
  func.func @transform_2(%arg0: i32, %arg1: i32, %arg2: i32) -> (i32, i32) {
    %c0_i32 = arith.constant 0 : i32
    %c0_i32_0 = arith.constant 0 : i32
    return %c0_i32, %arg1 : i32, i32
  }
  func.func @transform_3(%arg0: i32, %arg1: i32, %arg2: i32) -> (i32, i32) {
    %c0_i32 = arith.constant 0 : i32
    return %arg0, %arg1 : i32, i32
  }
}

module attributes {stable_mosaic.version = 11 : i64} {
  func.func @_mm_bias_act_kernel(%arg0: i32, %arg1: i32, %arg2: i32, %arg3: memref<16x20xbf16, #tpu.memory_space<vmem>>, %arg4: memref<20x128xbf16, #tpu.memory_space<vmem>>, %arg5: memref<1x128xf32, #tpu.memory_space<vmem>>, %arg6: memref<16x128xbf16, #tpu.memory_space<vmem>>, %arg7: memref<16x128xf32, #tpu.memory_space<vmem>>) attributes {dimension_semantics = [#tpu.dimension_semantics<parallel>, #tpu.dimension_semantics<parallel>, #tpu.dimension_semantics<arbitrary>], iteration_bounds = array<i64: 2, 1, 1>, scalar_prefetch = 0 : i64, scratch_operands = 1 : i64, tpu.core_type = #tpu.core_type<tc>, window_params = [{transform_indices = @transform_0, window_bounds = array<i64: 16, 20>}, {transform_indices = @transform_1, window_bounds = array<i64: 20, 128>}, {transform_indices = @transform_2, window_bounds = array<i64: 1, 128>}, {transform_indices = @transform_3, window_bounds = array<i64: 16, 128>}]} {
    %c0_i32 = arith.constant 0 : i32
    %0 = arith.cmpi eq, %arg2, %c0_i32 : i32
    %1 = arith.extui %0 : i1 to i32
    %c0_i32_0 = arith.constant 0 : i32
    %2 = arith.cmpi ne, %1, %c0_i32_0 : i32
    scf.if %2 {
      %cst_10 = arith.constant 0.000000e+00 : f32
      %12 = vector.broadcast %cst_10 : f32 to vector<16x128xf32>
      %c0_11 = arith.constant 0 : index
      %c0_12 = arith.constant 0 : index
      %13 = vector.load %arg7[%c0_11, %c0_12] : memref<16x128xf32, #tpu.memory_space<vmem>>, vector<16x128xf32>
      tpu.vector_store %arg7[%c0_11, %c0_12], %12 {strides = array<i32>} : memref<16x128xf32, #tpu.memory_space<vmem>>, vector<16x128xf32>,
    } else {
    }
    %c0 = arith.constant 0 : index
    %c0_1 = arith.constant 0 : index
    %3 = vector.load %arg7[%c0, %c0_1] : memref<16x128xf32, #tpu.memory_space<vmem>>, vector<16x128xf32>
    %c0_2 = arith.constant 0 : index
    %c0_3 = arith.constant 0 : index
    %4 = vector.load %arg3[%c0_2, %c0_3] : memref<16x20xbf16, #tpu.memory_space<vmem>>, vector<16x20xbf16>
    %c0_4 = arith.constant 0 : index
    %c0_5 = arith.constant 0 : index
    %5 = vector.load %arg4[%c0_4, %c0_5] : memref<20x128xbf16, #tpu.memory_space<vmem>>, vector<20x128xbf16>
    %cst = arith.constant dense<0.000000e+00> : vector<16x128xf32>
    %6 = tpu.matmul %4, %5, %cst {dimension_numbers = #tpu.dot_dimension_numbers<[1], [0], [0], [1], [0, 0, 1, 1], [], []>} : vector<16x20xbf16>, vector<20x128xbf16>, vector<16x128xf32> -> vector<16x128xf32>
    %7 = arith.addf %3, %6 : vector<16x128xf32>
    %c0_6 = arith.constant 0 : index
    %c0_7 = arith.constant 0 : index
    %8 = vector.load %arg7[%c0_6, %c0_7] : memref<16x128xf32, #tpu.memory_space<vmem>>, vector<16x128xf32>
    tpu.vector_store %arg7[%c0_6, %c0_7], %7 {strides = array<i32>} : memref<16x128xf32, #tpu.memory_space<vmem>>, vector<16x128xf32>,
    %c0_i32_8 = arith.constant 0 : i32
    %9 = arith.cmpi eq, %arg2, %c0_i32_8 : i32
    %10 = arith.extui %9 : i1 to i32
    %c0_i32_9 = arith.constant 0 : i32
    %11 = arith.cmpi ne, %10, %c0_i32_9 : i32
    scf.if %11 {
      %c0_10 = arith.constant 0 : index
      %c0_11 = arith.constant 0 : index
      %12 = vector.load %arg7[%c0_10, %c0_11] : memref<16x128xf32, #tpu.memory_space<vmem>>, vector<16x128xf32>
      %c0_12 = arith.constant 0 : index
      %c0_13 = arith.constant 0 : index
      %13 = vector.load %arg5[%c0_12, %c0_13] : memref<1x128xf32, #tpu.memory_space<vmem>>, vector<1x128xf32>
      %14 = vector.broadcast %13 : vector<1x128xf32> to vector<16x128xf32>
      %15 = arith.addf %12, %14 : vector<16x128xf32>
      %cst_14 = arith.constant 0.000000e+00 : f32
      %16 = vector.broadcast %cst_14 : f32 to vector<16x128xf32>
      %17 = arith.cmpf oge, %15, %16 : vector<16x128xf32>
      %cst_15 = arith.constant 1.000000e-01 : f32
      %18 = vector.broadcast %cst_15 : f32 to vector<16x128xf32>
      %19 = arith.mulf %18, %15 : vector<16x128xf32>
      %20 = arith.select %17, %15, %19 : vector<16x128xi1>, vector<16x128xf32>
      %21 = arith.truncf %20 : vector<16x128xf32> to vector<16x128xbf16>
      %c0_16 = arith.constant 0 : index
      %c0_17 = arith.constant 0 : index
      %22 = vector.load %arg6[%c0_16, %c0_17] : memref<16x128xbf16, #tpu.memory_space<vmem>>, vector<16x128xbf16>
      tpu.vector_store %arg6[%c0_16, %c0_17], %21 {strides = array<i32>} : memref<16x128xbf16, #tpu.memory_space<vmem>>, vector<16x128xbf16>,
    } else {
    }
    return
  }
  func.func @transform_0(%arg0: i32, %arg1: i32, %arg2: i32) -> (i32, i32) {
    %c0_i32 = arith.constant 0 : i32
    return %arg0, %arg2 : i32, i32
  }
  func.func @transform_1(%arg0: i32, %arg1: i32, %arg2: i32) -> (i32, i32) {
    %c0_i32 = arith.constant 0 : i32
    return %arg2, %arg1 : i32, i32
  }
  func.func @transform_2(%arg0: i32, %arg1: i32, %arg2: i32) -> (i32, i32) {
    %c0_i32 = arith.constant 0 : i32
    %c0_i32_0 = arith.constant 0 : i32
    return %c0_i32, %arg1 : i32, i32
  }
  func.func @transform_3(%arg0: i32, %arg1: i32, %arg2: i32) -> (i32, i32) {
    %c0_i32 = arith.constant 0 : i32
    return %arg0, %arg1 : i32, i32
  }
}

</mosaic_0001>

<bundles_post_ra>
// kernel: _lambda_.12
= control target key start
LH: loop header
LB: loop body
LE: loop exit
PB: predicated region body
PF: predicated region fallthrough
CT: control target
= control target key end

     0   :  { %s625_s12 = smov 0   ;;  %s627_s13 = smov 0   ;;  %s671_s0 = inlined_call_operand.vmem [shape: bf16[96,5], index: 0, kind: input, shape index: {}]   ;;  %s672_s1 = inlined_call_operand.vmem [shape: bf16[5,128], index: 1, kind: input, shape index: {}]   ;;  %s673_s2 = inlined_call_operand.vmem [shape: f32[1,128], index: 2, kind: input, shape index: {}]   ;;  %s674_s3 = inlined_call_operand.vmem [shape: bf16[96,128], index: 3, kind: output, shape index: {}]  }
   0x1   :  { %s629_s14 = smov 0  }
   0x2 LB: > { %s32_s15 = sadd.s32 1, %s598_s13  ;;  %p512_p0 = scmp.ge.s32.totalorder %s602_s14, 1  ;;  %s602_s14 = sphi %s629_s14, %s13_s14   ;;  %s598_s13 = sphi %s627_s13, %s676_s13   ;;  %s594_s12 = sphi %s625_s12, %s675_s12  }
   0x3   : > { %p34_p1 = scmp.ge.s32.totalorder %s32_s15, 2  ;;  %p186_p2 = scmp.lt.s32.totalorder %s602_s14, 3 }
   0x5   : > { %s678_s15 = smov (%p34_p1, %s32_s15), 0  ;;  %p187_p3 = pnand %p512_p0, %p186_p2 }
   0x6   : > { %s226_s18 = smul.u32 (!%p187_p3), 6, %s594_s12 }
   0x7   : > { %190 = sbr.rel (%p187_p3) target bundleno = 169 (0xa9), region = 32 }
   0x8   : > { %p227_p4 = scmp.lt.s32.totalorder (!%p187_p3), %s226_s18, 11 }
   0xc   : > { %v277_v0 = vld [vmem:[%s672_s1] sm:$0x7]  ;;  %vm303_vm0 = vcmask 1041408   ;;  %vm304_vm1 = vcmask 1042432   ;;  %v604_v1 = vmov 65535   ;;  %s680_s18 = smov (!%p227_p4, %s226_s18), 11 }
   0xd   : > { %v305_v2 = vsel %vm303_vm0, 4294967295, %v604_v1  ;;  %s513_s19 = sshll.u32 %s680_s18, 2  ;;  %vm293_vm2 = vcmask 39936   ;;  %v579_v10 = vld [vmem:[%s673_s2] ss:$0 sm:$0xff] }
   0xe   : > { %v306_v3 = vsel %vm304_vm1, %v305_v2, 0  ;;  %s233_s22 = scalar_lea.vmem %s671_s0, %s513_s19  ;;  %s252_s27 = scalar_lea.vmem %s674_s3, %s513_s19 }
   0xf   : > { %v308_v4 = vand.u32 %v306_v3, %v277_v0  ;;  %v532_v5 = vld [vmem:[%s233_s22] sm:$0xff]  ;;  %v533_v6 = vld [vmem:[%s233_s22 + $0x8] sm:$0xff]  ;;  %v534_v7 = vld [vmem:[%s233_s22 + $0x10] sm:$0xff] }
  0x11   : > { %317 = vmatpush.bf16.msra.mxu0 %v308_v4  ;;  %552 = vmatpush.bf16.msra.mxu1 %v308_v4 }
  0x12   : > { %553 = vmatpush.bf16.msra.mxu2 %v308_v4 }
  0x14   : > { %527 = vmatmul.msk.bf16.vlgmr.msra.gmra.mxu0 %vm293_vm2, %v532_v5  ;;  %528 = vmatmul.msk.bf16.vlgmr.msra.gmra.mxu1 %vm293_vm2, %v533_v6 }
  0x15   : > { %529 = vmatmul.msk.bf16.vlgmr.msra.gmra.mxu2 %vm293_vm2, %v534_v7 }
  0x91   : > { %v319_v8 = vpop.f32.mrf.mxu0  ;;  %v324_v9 = vpop.f32.mrf.mxu1 }
  0x92   : > { %v359_v11 = vadd.f32 %v579_v10, %v319_v8  ;;  %v361_v12 = vadd.f32 %v579_v10, %v324_v9 }
  0x94   : > { %v371_v16 = vmul.f32 0.1, %v359_v11  ;;  %v373_v17 = vmul.f32 0.1, %v361_v12  ;;  %vm365_vm3 = vcmp.ge.f32.partialorder %v359_v11, 0.0  ;;  %vm367_vm4 = vcmp.ge.f32.partialorder %v361_v12, 0.0 }
  0x96   : > { %v377_v23 = vsel %vm365_vm3, %v359_v11, %v371_v16  ;;  %v379_v24 = vsel %vm367_vm4, %v361_v12, %v373_v17 }
  0x98   : > { %v329_v13 = vpop.f32.mrf.mxu2 }
  0x99   : > { %v321_v14 = vpop.f32.mrf.mxu0  ;;  %v326_v15 = vpop.f32.mrf.mxu1  ;;  %v363_v22 = vadd.f32 %v579_v10, %v329_v13 }
  0x9a   : > { %v360_v18 = vadd.f32 %v579_v10, %v321_v14  ;;  %v362_v19 = vadd.f32 %v579_v10, %v326_v15 }
  0x9b   : > { %v375_v30 = vmul.f32 0.1, %v363_v22  ;;  %vm369_vm7 = vcmp.ge.f32.partialorder %v363_v22, 0.0 }
  0x9c   : > { %vm366_vm5 = vcmp.ge.f32.partialorder %v360_v18, 0.0  ;;  %v372_v20 = vmul.f32 0.1, %v360_v18  ;;  %vm368_vm6 = vcmp.ge.f32.partialorder %v362_v19, 0.0  ;;  %v374_v21 = vmul.f32 0.1, %v362_v19 }
  0x9d   : > { %v381_v33 = vsel %vm369_vm7, %v363_v22, %v375_v30 }
  0x9e   : > { %v378_v25 = vsel %vm366_vm5, %v360_v18, %v372_v20  ;;  %v380_v26 = vsel %vm368_vm6, %v362_v19, %v374_v21 }
  0x9f   : > { %v538_v27 = vpack.c.bf16 %v378_v25, %v377_v23  ;;  %v543_v28 = vpack.c.bf16 %v380_v26, %v379_v24 }
  0xa0   : > { %v331_v29 = vpop.f32.mrf.mxu2 }
  0xa1   : > { %539 = vst [vmem:[%s252_s27] sm:$0xff] %v538_v27   ;;  %v364_v31 = vadd.f32 %v579_v10, %v331_v29 }
  0xa2   : > { %550 = vst [vmem:[%s252_s27 + $0x8] sm:$0xff] %v543_v28  }
  0xa3   : > { %vm370_vm8 = vcmp.ge.f32.partialorder %v364_v31, 0.0  ;;  %v376_v32 = vmul.f32 0.1, %v364_v31 }
  0xa5   : > { %v382_v34 = vsel %vm370_vm8, %v364_v31, %v376_v32 }
  0xa6   : > { %v548_v35 = vpack.c.bf16 %v382_v34, %v381_v33 }
  0xa8   : > { %551 = vst [vmem:[%s252_s27 + $0x10] sm:$0xff] %v548_v35  }
  0xa9 PF: > { %s13_s14 = sadd.s32 1, %s602_s14   ;;  %s675_s12 = smov %s598_s13 }
  0xaa   : > { %p10_p5 = scmp.ge.s32.totalorder %s13_s14, 4   ;;  %s676_s13 = smov %s678_s15 }
  0xac   :  { %12 = sbr.rel (!%p10_p5) target bundleno = 2 (0x2), region = 76 }

// kernel: _lambda_.20
= control target key start
LH: loop header
LB: loop body
LE: loop exit
PB: predicated region body
PF: predicated region fallthrough
CT: control target
= control target key end

     0   :  { %vm70_vm0 = vcmask 654336   ;;  %s198_s1 = inlined_call_operand.vmem [shape: bf16[80,128], index: 1, kind: input, shape index: {}]   ;;  %s199_s2 = inlined_call_operand.vmem [shape: f32[1,128], index: 2, kind: input, shape index: {}]   ;;  %s200_s0 = inlined_call_operand.vmem [shape: bf16[16,80], index: 0, kind: input, shape index: {}]   ;;  %s201_s3 = inlined_call_operand.vmem [shape: bf16[16,128], index: 3, kind: output, shape index: {}]  }
   0x1   :  { %v147_v0 = vld [vmem:[%s198_s1 + $0x20] sm:$0xff]  ;;  %v146_v1 = vld [vmem:[%s198_s1 + $0x18] sm:$0xff]  ;;  %v145_v2 = vld [vmem:[%s198_s1 + $0x10] sm:$0xff] }
   0x2   :  { %77 = vmatpush.bf16.msra.mxu0 %v147_v0  ;;  %v144_v3 = vld [vmem:[%s198_s1 + $0x8] sm:$0xff]  ;;  %v143_v4 = vld [vmem:[%s198_s1] sm:$0xff] }
   0x3   :  { %v142_v5 = vld [vmem:[%s200_s0] sm:$0xff] }
   0x4   :  { %v153_v7 = vld [vmem:[%s199_s2] ss:$0 sm:$0xff] }
   0x6   :  { %78 = vmatpush.bf16.msra.mxu0 %v146_v1 }
   0xa   :  { %79 = vmatpush.bf16.msra.mxu0 %v145_v2 }
   0xe   :  { %80 = vmatpush.bf16.msra.mxu0 %v144_v3 }
  0x12   :  { %81 = vmatpush.bf16.msra.mxu0 %v143_v4 }
  0x15   :  { %141 = vmatmul.msk.bf16.vlgmr.msra.gmra.mxu0 %vm70_vm0, %v142_v5 }
  0x92   :  { %v83_v6 = vpop.f32.mrf.mxu0 }
  0x93   :  { %v101_v8 = vadd.f32 %v153_v7, %v83_v6 }
  0x95   :  { %v105_v10 = vmul.f32 0.1, %v101_v8  ;;  %vm103_vm1 = vcmp.ge.f32.partialorder %v101_v8, 0.0 }
  0x97   :  { %v107_v13 = vsel %vm103_vm1, %v101_v8, %v105_v10 }
  0x9a   :  { %v85_v9 = vpop.f32.mrf.mxu0 }
  0x9b   :  { %v102_v11 = vadd.f32 %v153_v7, %v85_v9 }
  0x9d   :  { %vm104_vm2 = vcmp.ge.f32.partialorder %v102_v11, 0.0  ;;  %v106_v12 = vmul.f32 0.1, %v102_v11 }
  0x9f   :  { %v108_v14 = vsel %vm104_vm2, %v102_v11, %v106_v12 }
  0xa0   :  { %v151_v15 = vpack.c.bf16 %v108_v14, %v107_v13 }
  0xa2   :  { %152 = vst [vmem:[%s201_s3] sm:$0xff] %v151_v15  }

// kernel: _lambda_.19
= control target key start
LH: loop header
LB: loop body
LE: loop exit
PB: predicated region body
PF: predicated region fallthrough
CT: control target
= control target key end

     0   :  { %s594_s12 = smov 0   ;;  %s596_s13 = smov 0   ;;  %s643_s0 = inlined_call_operand.vmem [shape: bf16[64,20], index: 0, kind: input, shape index: {}]   ;;  %s644_s1 = inlined_call_operand.vmem [shape: bf16[20,128], index: 1, kind: input, shape index: {}]   ;;  %s645_s2 = inlined_call_operand.vmem [shape: f32[1,128], index: 2, kind: input, shape index: {}]   ;;  %s646_s3 = inlined_call_operand.vmem [shape: bf16[64,128], index: 3, kind: output, shape index: {}]  }
   0x1   :  { %s598_s14 = smov 0  }
   0x2 LB: > { %s32_s15 = sadd.s32 1, %s568_s13  ;;  %p488_p0 = scmp.ge.s32.totalorder %s572_s14, 1  ;;  %s572_s14 = sphi %s598_s14, %s13_s14   ;;  %s568_s13 = sphi %s596_s13, %s648_s13   ;;  %s564_s12 = sphi %s594_s12, %s647_s12  }
   0x3   : > { %p34_p1 = scmp.ge.s32.totalorder %s32_s15, 2  ;;  %p188_p2 = scmp.lt.s32.totalorder %s572_s14, 3 }
   0x5   : > { %s650_s15 = smov (%p34_p1, %s32_s15), 0  ;;  %p189_p3 = pnand %p488_p0, %p188_p2 }
   0x6   : > { %s489_s18 = sshll.u32 (!%p189_p3), %s564_s12, 2 }
   0x7   : > { %192 = sbr.rel (%p189_p3) target bundleno = 168 (0xa8), region = 32  ;;  %p230_p4 = scmp.lt.s32.totalorder (!%p189_p3), %s489_s18, 7 }
   0xc   : > { %v278_v0 = vld [vmem:[%s644_s1 + $0x8] sm:$0x3]  ;;  %vm305_vm0 = vcmask 1041408   ;;  %s652_s18 = smov (!%p230_p4, %s489_s18), 7  ;;  %v511_v4 = vld [vmem:[%s644_s1] sm:$0xff]  ;;  %vm298_vm1 = vcmask 162816  }
   0xd   : > { %v294_v1 = vunpack.c.l.b16 %v278_v0  ;;  %s490_s19 = sshll.u32 %s652_s18, 2  ;;  %v549_v9 = vld [vmem:[%s645_s2] ss:$0 sm:$0xff] }
   0xe   : > { %s236_s24 = scalar_lea.vmem %s643_s0, %s490_s19  ;;  %s257_s29 = scalar_lea.vmem %s646_s3, %s490_s19 }
   0xf   : > { %v296_v2 = vpack.c.b16 %v294_v1, %v294_v1  ;;  %v509_v5 = vld [vmem:[%s236_s24] sm:$0xff]  ;;  %v510_v6 = vld [vmem:[%s236_s24 + $0x8] sm:$0xff] }
  0x11   : > { %v307_v3 = vsel %vm305_vm0, %v296_v2, 0 }
  0x12   : > { %315 = vmatpush.bf16.msra.mxu0 %v307_v3  ;;  %523 = vmatpush.bf16.msra.mxu1 %v307_v3 }
  0x16   : > { %316 = vmatpush.bf16.msra.mxu0 %v511_v4  ;;  %524 = vmatpush.bf16.msra.mxu1 %v511_v4 }
  0x19   : > { %505 = vmatmul.msk.bf16.vlgmr.msra.gmra.mxu0 %vm298_vm1, %v509_v5  ;;  %506 = vmatmul.msk.bf16.vlgmr.msra.gmra.mxu1 %vm298_vm1, %v510_v6 }
  0x96   : > { %v318_v7 = vpop.f32.mrf.mxu0  ;;  %v323_v8 = vpop.f32.mrf.mxu1 }
  0x97   : > { %v347_v10 = vadd.f32 %v549_v9, %v318_v7  ;;  %v349_v11 = vadd.f32 %v549_v9, %v323_v8 }
  0x99   : > { %v355_v14 = vmul.f32 0.1, %v347_v10  ;;  %v357_v15 = vmul.f32 0.1, %v349_v11  ;;  %vm351_vm2 = vcmp.ge.f32.partialorder %v347_v10, 0.0  ;;  %vm353_vm3 = vcmp.ge.f32.partialorder %v349_v11, 0.0 }
  0x9b   : > { %v359_v20 = vsel %vm351_vm2, %v347_v10, %v355_v14  ;;  %v361_v21 = vsel %vm353_vm3, %v349_v11, %v357_v15 }
  0x9e   : > { %v320_v12 = vpop.f32.mrf.mxu0  ;;  %v325_v13 = vpop.f32.mrf.mxu1 }
  0x9f   : > { %v348_v16 = vadd.f32 %v549_v9, %v320_v12  ;;  %v350_v17 = vadd.f32 %v549_v9, %v325_v13 }
  0xa1   : > { %vm352_vm4 = vcmp.ge.f32.partialorder %v348_v16, 0.0  ;;  %v356_v18 = vmul.f32 0.1, %v348_v16  ;;  %vm354_vm5 = vcmp.ge.f32.partialorder %v350_v17, 0.0  ;;  %v358_v19 = vmul.f32 0.1, %v350_v17 }
  0xa3   : > { %v360_v22 = vsel %vm352_vm4, %v348_v16, %v356_v18  ;;  %v362_v23 = vsel %vm354_vm5, %v350_v17, %v358_v19 }
  0xa4   : > { %v515_v24 = vpack.c.bf16 %v360_v22, %v359_v20  ;;  %v520_v25 = vpack.c.bf16 %v362_v23, %v361_v21 }
  0xa6   : > { %516 = vst [vmem:[%s257_s29] sm:$0xff] %v515_v24  }
  0xa7   : > { %522 = vst [vmem:[%s257_s29 + $0x8] sm:$0xff] %v520_v25  }
  0xa8 PF: > { %s13_s14 = sadd.s32 1, %s572_s14   ;;  %s647_s12 = smov %s568_s13 }
  0xa9   : > { %p10_p5 = scmp.ge.s32.totalorder %s13_s14, 4   ;;  %s648_s13 = smov %s650_s15 }
  0xab   :  { %12 = sbr.rel (!%p10_p5) target bundleno = 2 (0x2), region = 76 }

// kernel: _lambda_.21
= control target key start
LH: loop header
LB: loop body
LE: loop exit
PB: predicated region body
PF: predicated region fallthrough
CT: control target
= control target key end

     0   :  { %vm202_vm0 = vcmask 523264   ;;  %s503_s1 = inlined_call_operand.vmem [shape: bf16[320,128], index: 1, kind: input, shape index: {}]   ;;  %s504_s0 = inlined_call_operand.vmem [shape: bf16[16,320], index: 0, kind: input, shape index: {}]   ;;  %s505_s2 = inlined_call_operand.vmem [shape: f32[1,128], index: 2, kind: input, shape index: {}]   ;;  %s506_s3 = inlined_call_operand.vmem [shape: bf16[16,128], index: 3, kind: output, shape index: {}]  }
   0x1   :  { %v380_v0 = vld [vmem:[%s503_s1 + $0x38] sm:$0xff]  ;;  %v379_v3 = vld [vmem:[%s503_s1 + $0x30] sm:$0xff]  ;;  %v378_v6 = vld [vmem:[%s503_s1 + $0x28] sm:$0xff] }
   0x2   :  { %v388_v1 = vld [vmem:[%s503_s1 + $0x78] sm:$0xff]  ;;  %206 = vmatpush.bf16.msra.mxu0 %v380_v0  ;;  %v387_v4 = vld [vmem:[%s503_s1 + $0x70] sm:$0xff]  ;;  %v386_v7 = vld [vmem:[%s503_s1 + $0x68] sm:$0xff] }
   0x3   :  { %v392_v2 = vld [vmem:[%s503_s1 + $0x98] sm:$0xff]  ;;  %220 = vmatpush.bf16.msra.mxu1 %v388_v1  ;;  %v391_v5 = vld [vmem:[%s503_s1 + $0x90] sm:$0xff]  ;;  %v390_v8 = vld [vmem:[%s503_s1 + $0x88] sm:$0xff] }
   0x4   :  { %238 = vmatpush.bf16.msra.mxu2 %v392_v2  ;;  %v377_v9 = vld [vmem:[%s503_s1 + $0x20] sm:$0xff]  ;;  %v287_v12 = vld [vmem:[%s504_s0 + $0x8] sm:$0xf]  ;;  %v372_v13 = vld [vmem:[%s504_s0 + $0x10] sm:$0xf0] }
   0x5   :  { %v385_v10 = vld [vmem:[%s503_s1 + $0x60] sm:$0xff]  ;;  %v376_v14 = vld [vmem:[%s503_s1 + $0x18] sm:$0xff]  ;;  %v288_v16 = vor.u32 %v372_v13, %v287_v12  ;;  %v375_v17 = vld [vmem:[%s503_s1 + $0x10] sm:$0xff] }
   0x6   :  { %207 = vmatpush.bf16.msra.mxu0 %v379_v3  ;;  %v389_v11 = vld [vmem:[%s503_s1 + $0x80] sm:$0xff]  ;;  %v384_v15 = vld [vmem:[%s503_s1 + $0x58] sm:$0xff]  ;;  %v383_v18 = vld [vmem:[%s503_s1 + $0x50] sm:$0xff] }
   0x7   :  { %221 = vmatpush.bf16.msra.mxu1 %v387_v4  ;;  %v374_v19 = vld [vmem:[%s503_s1 + $0x8] sm:$0xff]  ;;  %v373_v21 = vld [vmem:[%s503_s1] sm:$0xff]  ;;  %v281_v26 = vld [vmem:[%s504_s0 + $0xc] sm:$0xf0] }
   0x8   :  { %239 = vmatpush.bf16.msra.mxu2 %v391_v5  ;;  %v382_v20 = vld [vmem:[%s503_s1 + $0x48] sm:$0xff]  ;;  %v381_v22 = vld [vmem:[%s503_s1 + $0x40] sm:$0xff] }
   0x9   :  { %v279_v23 = vld [vmem:[%s504_s0] sm:$0xf]  ;;  %v371_v24 = vld [vmem:[%s504_s0 + $0x8] sm:$0xf0]  ;;  %v370_v25 = vld [vmem:[%s504_s0 + $0x4] sm:$0xf] }
   0xa   :  { %208 = vmatpush.bf16.msra.mxu0 %v378_v6  ;;  %v280_v27 = vor.u32 %v371_v24, %v279_v23  ;;  %v284_v28 = vor.u32 %v370_v25, %v281_v26  ;;  %v398_v34 = vld [vmem:[%s505_s2] ss:$0 sm:$0xff] }
   0xb   :  { %222 = vmatpush.bf16.msra.mxu1 %v386_v7 }
   0xc   :  { %240 = vmatpush.bf16.msra.mxu2 %v390_v8 }
   0xe   :  { %209 = vmatpush.bf16.msra.mxu0 %v377_v9 }
   0xf   :  { %223 = vmatpush.bf16.msra.mxu1 %v385_v10 }
  0x10   :  { %241 = vmatpush.bf16.msra.mxu2 %v389_v11 }
  0x12   :  { %210 = vmatpush.bf16.msra.mxu0 %v376_v14 }
  0x13   :  { %224 = vmatpush.bf16.msra.mxu1 %v384_v15  ;;  %369 = vmatmul.msk.bf16.vlgmr.msra.gmra.mxu2 %vm202_vm0, %v288_v16 }
  0x16   :  { %211 = vmatpush.bf16.msra.mxu0 %v375_v17 }
  0x17   :  { %225 = vmatpush.bf16.msra.mxu1 %v383_v18 }
  0x1a   :  { %212 = vmatpush.bf16.msra.mxu0 %v374_v19 }
  0x1b   :  { %226 = vmatpush.bf16.msra.mxu1 %v382_v20 }
  0x1e   :  { %213 = vmatpush.bf16.msra.mxu0 %v373_v21 }
  0x1f   :  { %227 = vmatpush.bf16.msra.mxu1 %v381_v22 }
  0x21   :  { %214 = vmatmul.bf16.vlgmr.msra.gmra.mxu0 %v280_v27 }
  0x22   :  { %228 = vmatmul.bf16.vlgmr.msra.gmra.mxu1 %v284_v28 }
  0x96   :  { %v243_v29 = vpop.f32.mrf.mxu2 }
  0x9e   :  { %v215_v30 = vpop.f32.mrf.mxu0  ;;  %v245_v39 = vpop.f32.mrf.mxu2 }
  0x9f   :  { %v229_v31 = vpop.f32.mrf.mxu1 }
  0xa0   :  { %v230_v32 = vadd.f32 %v229_v31, %v215_v30 }
  0xa2   :  { %v244_v33 = vadd.f32 %v243_v29, %v230_v32 }
  0xa4   :  { %v261_v37 = vadd.f32 %v398_v34, %v244_v33 }
  0xa6   :  { %v217_v35 = vpop.f32.mrf.mxu0  ;;  %v265_v41 = vmul.f32 0.1, %v261_v37  ;;  %vm263_vm1 = vcmp.ge.f32.partialorder %v261_v37, 0.0 }
  0xa7   :  { %v231_v36 = vpop.f32.mrf.mxu1 }
  0xa8   :  { %v232_v38 = vadd.f32 %v231_v36, %v217_v35  ;;  %v267_v44 = vsel %vm263_vm1, %v261_v37, %v265_v41 }
  0xaa   :  { %v246_v40 = vadd.f32 %v245_v39, %v232_v38 }
  0xac   :  { %v262_v42 = vadd.f32 %v398_v34, %v246_v40 }
  0xae   :  { %vm264_vm2 = vcmp.ge.f32.partialorder %v262_v42, 0.0  ;;  %v266_v43 = vmul.f32 0.1, %v262_v42 }
  0xb0   :  { %v268_v45 = vsel %vm264_vm2, %v262_v42, %v266_v43 }
  0xb1   :  { %v396_v46 = vpack.c.bf16 %v268_v45, %v267_v44 }
  0xb3   :  { %397 = vst [vmem:[%s506_s3] sm:$0xff] %v396_v46  }

// kernel: _lambda_.23
= control target key start
LH: loop header
LB: loop body
LE: loop exit
PB: predicated region body
PF: predicated region fallthrough
CT: control target
= control target key end

     0   :  { %s556_s1 = inlined_call_operand.vmem [shape: bf16[384,128], index: 1, kind: input, shape index: {}]   ;;  %s557_s0 = inlined_call_operand.vmem [shape: bf16[16,384], index: 0, kind: input, shape index: {}]   ;;  %s558_s2 = inlined_call_operand.vmem [shape: f32[1,128], index: 2, kind: input, shape index: {}]   ;;  %s559_s3 = inlined_call_operand.vmem [shape: bf16[16,128], index: 3, kind: output, shape index: {}]  }
   0x1   :  { %v417_v0 = vld [vmem:[%s556_s1 + $0x38] sm:$0xff]  ;;  %v416_v3 = vld [vmem:[%s556_s1 + $0x30] sm:$0xff]  ;;  %v415_v6 = vld [vmem:[%s556_s1 + $0x28] sm:$0xff] }
   0x2   :  { %v425_v1 = vld [vmem:[%s556_s1 + $0x78] sm:$0xff]  ;;  %234 = vmatpush.bf16.msra.mxu0 %v417_v0  ;;  %v424_v4 = vld [vmem:[%s556_s1 + $0x70] sm:$0xff]  ;;  %v423_v7 = vld [vmem:[%s556_s1 + $0x68] sm:$0xff] }
   0x3   :  { %v433_v2 = vld [vmem:[%s556_s1 + $0xb8] sm:$0xff]  ;;  %248 = vmatpush.bf16.msra.mxu1 %v425_v1  ;;  %v432_v5 = vld [vmem:[%s556_s1 + $0xb0] sm:$0xff]  ;;  %v431_v8 = vld [vmem:[%s556_s1 + $0xa8] sm:$0xff] }
   0x4   :  { %262 = vmatpush.bf16.msra.mxu2 %v433_v2  ;;  %v414_v9 = vld [vmem:[%s556_s1 + $0x20] sm:$0xff]  ;;  %v413_v12 = vld [vmem:[%s556_s1 + $0x18] sm:$0xff]  ;;  %v412_v15 = vld [vmem:[%s556_s1 + $0x10] sm:$0xff] }
   0x5   :  { %v422_v10 = vld [vmem:[%s556_s1 + $0x60] sm:$0xff]  ;;  %v421_v13 = vld [vmem:[%s556_s1 + $0x58] sm:$0xff]  ;;  %v420_v16 = vld [vmem:[%s556_s1 + $0x50] sm:$0xff] }
   0x6   :  { %235 = vmatpush.bf16.msra.mxu0 %v416_v3  ;;  %v430_v11 = vld [vmem:[%s556_s1 + $0xa0] sm:$0xff]  ;;  %v429_v14 = vld [vmem:[%s556_s1 + $0x98] sm:$0xff]  ;;  %v428_v17 = vld [vmem:[%s556_s1 + $0x90] sm:$0xff] }
   0x7   :  { %249 = vmatpush.bf16.msra.mxu1 %v424_v4  ;;  %v411_v18 = vld [vmem:[%s556_s1 + $0x8] sm:$0xff]  ;;  %v410_v21 = vld [vmem:[%s556_s1] sm:$0xff]  ;;  %v303_v26 = vld [vmem:[%s557_s0 + $0xc] sm:$0xf0] }
   0x8   :  { %263 = vmatpush.bf16.msra.mxu2 %v432_v5  ;;  %v419_v19 = vld [vmem:[%s556_s1 + $0x48] sm:$0xff]  ;;  %v418_v22 = vld [vmem:[%s556_s1 + $0x40] sm:$0xff]  ;;  %v409_v29 = vld [vmem:[%s557_s0 + $0x10] sm:$0xf0] }
   0x9   :  { %v427_v20 = vld [vmem:[%s556_s1 + $0x88] sm:$0xff]  ;;  %v301_v23 = vld [vmem:[%s557_s0] sm:$0xf]  ;;  %v407_v25 = vld [vmem:[%s557_s0 + $0x4] sm:$0xf] }
   0xa   :  { %236 = vmatpush.bf16.msra.mxu0 %v415_v6  ;;  %v408_v24 = vld [vmem:[%s557_s0 + $0x8] sm:$0xf0]  ;;  %v426_v27 = vld [vmem:[%s556_s1 + $0x80] sm:$0xff]  ;;  %v309_v28 = vld [vmem:[%s557_s0 + $0x8] sm:$0xf]  ;;  %v306_v31 = vor.u32 %v407_v25, %v303_v26 }
   0xb   :  { %250 = vmatpush.bf16.msra.mxu1 %v423_v7  ;;  %v302_v30 = vor.u32 %v408_v24, %v301_v23  ;;  %v310_v32 = vor.u32 %v409_v29, %v309_v28  ;;  %v439_v40 = vld [vmem:[%s558_s2] ss:$0 sm:$0xff] }
   0xc   :  { %264 = vmatpush.bf16.msra.mxu2 %v431_v8 }
   0xe   :  { %237 = vmatpush.bf16.msra.mxu0 %v414_v9 }
   0xf   :  { %251 = vmatpush.bf16.msra.mxu1 %v422_v10 }
  0x10   :  { %265 = vmatpush.bf16.msra.mxu2 %v430_v11 }
  0x12   :  { %238 = vmatpush.bf16.msra.mxu0 %v413_v12 }
  0x13   :  { %252 = vmatpush.bf16.msra.mxu1 %v421_v13 }
  0x14   :  { %266 = vmatpush.bf16.msra.mxu2 %v429_v14 }
  0x16   :  { %239 = vmatpush.bf16.msra.mxu0 %v412_v15 }
  0x17   :  { %253 = vmatpush.bf16.msra.mxu1 %v420_v16 }
  0x18   :  { %267 = vmatpush.bf16.msra.mxu2 %v428_v17 }
  0x1a   :  { %240 = vmatpush.bf16.msra.mxu0 %v411_v18 }
  0x1b   :  { %254 = vmatpush.bf16.msra.mxu1 %v419_v19 }
  0x1c   :  { %268 = vmatpush.bf16.msra.mxu2 %v427_v20 }
  0x1e   :  { %241 = vmatpush.bf16.msra.mxu0 %v410_v21 }
  0x1f   :  { %255 = vmatpush.bf16.msra.mxu1 %v418_v22 }
  0x20   :  { %269 = vmatpush.bf16.msra.mxu2 %v426_v27 }
  0x21   :  { %242 = vmatmul.bf16.vlgmr.msra.gmra.mxu0 %v302_v30 }
  0x22   :  { %256 = vmatmul.bf16.vlgmr.msra.gmra.mxu1 %v306_v31 }
  0x23   :  { %270 = vmatmul.bf16.vlgmr.msra.gmra.mxu2 %v310_v32 }
  0x9e   :  { %v243_v33 = vpop.f32.mrf.mxu0 }
  0x9f   :  { %v257_v34 = vpop.f32.mrf.mxu1 }
  0xa0   :  { %v258_v36 = vadd.f32 %v257_v34, %v243_v33 }
  0xa6   :  { %v271_v35 = vpop.f32.mrf.mxu2  ;;  %v245_v37 = vpop.f32.mrf.mxu0 }
  0xa7   :  { %v259_v38 = vpop.f32.mrf.mxu1  ;;  %v272_v39 = vadd.f32 %v271_v35, %v258_v36 }
  0xa8   :  { %v260_v41 = vadd.f32 %v259_v38, %v245_v37 }
  0xa9   :  { %v289_v44 = vadd.f32 %v439_v40, %v272_v39 }
  0xae   :  { %v273_v42 = vpop.f32.mrf.mxu2 }
  0xaf   :  { %v274_v43 = vadd.f32 %v273_v42, %v260_v41 }
  0xb1   :  { %v290_v45 = vadd.f32 %v439_v40, %v274_v43 }
  0xb3   :  { %v437_v46 = vpack.c.bf16 %v290_v45, %v289_v44 }
  0xb5   :  { %438 = vst [vmem:[%s559_s3] sm:$0xff] %v437_v46  }

// kernel: _lambda_.22
= control target key start
LH: loop header
LB: loop body
LE: loop exit
PB: predicated region body
PF: predicated region fallthrough
CT: control target
= control target key end

     0   :  { %s880_s1 = inlined_call_operand.vmem [shape: bf16[640,128], index: 1, kind: input, shape index: {}]   ;;  %s881_s0 = inlined_call_operand.vmem [shape: bf16[16,640], index: 0, kind: input, shape index: {}]   ;;  %s882_s2 = inlined_call_operand.vmem [shape: f32[1,128], index: 2, kind: input, shape index: {}]   ;;  %s883_s3 = inlined_call_operand.vmem [shape: bf16[16,128], index: 3, kind: output, shape index: {}]  }
   0x1   :  { %v665_v0 = vld [vmem:[%s880_s1 + $0x38] sm:$0xff]  ;;  %v664_v4 = vld [vmem:[%s880_s1 + $0x30] sm:$0xff]  ;;  %v663_v8 = vld [vmem:[%s880_s1 + $0x28] sm:$0xff] }
   0x2   :  { %v681_v1 = vld [vmem:[%s880_s1 + $0xb8] sm:$0xff]  ;;  %374 = vmatpush.bf16.msra.mxu0 %v665_v0  ;;  %v680_v5 = vld [vmem:[%s880_s1 + $0xb0] sm:$0xff]  ;;  %v679_v9 = vld [vmem:[%s880_s1 + $0xa8] sm:$0xff] }
   0x3   :  { %v689_v2 = vld [vmem:[%s880_s1 + $0xf8] sm:$0xff]  ;;  %402 = vmatpush.bf16.msra.mxu2 %v681_v1  ;;  %v688_v6 = vld [vmem:[%s880_s1 + $0xf0] sm:$0xff]  ;;  %v687_v10 = vld [vmem:[%s880_s1 + $0xe8] sm:$0xff] }
   0x4   :  { %v673_v3 = vld [vmem:[%s880_s1 + $0x78] sm:$0xff]  ;;  %416 = vmatpush.bf16.msra.mxu3 %v689_v2  ;;  %v672_v7 = vld [vmem:[%s880_s1 + $0x70] sm:$0xff]  ;;  %v671_v11 = vld [vmem:[%s880_s1 + $0x68] sm:$0xff] }
   0x5   :  { %388 = vmatpush.bf16.msra.mxu1 %v673_v3  ;;  %v662_v12 = vld [vmem:[%s880_s1 + $0x20] sm:$0xff]  ;;  %v661_v16 = vld [vmem:[%s880_s1 + $0x18] sm:$0xff]  ;;  %v660_v20 = vld [vmem:[%s880_s1 + $0x10] sm:$0xff] }
   0x6   :  { %375 = vmatpush.bf16.msra.mxu0 %v664_v4  ;;  %v678_v13 = vld [vmem:[%s880_s1 + $0xa0] sm:$0xff]  ;;  %v677_v17 = vld [vmem:[%s880_s1 + $0x98] sm:$0xff]  ;;  %v676_v21 = vld [vmem:[%s880_s1 + $0x90] sm:$0xff] }
   0x7   :  { %403 = vmatpush.bf16.msra.mxu2 %v680_v5  ;;  %v686_v14 = vld [vmem:[%s880_s1 + $0xe0] sm:$0xff]  ;;  %v685_v18 = vld [vmem:[%s880_s1 + $0xd8] sm:$0xff]  ;;  %v684_v22 = vld [vmem:[%s880_s1 + $0xd0] sm:$0xff] }
   0x8   :  { %417 = vmatpush.bf16.msra.mxu3 %v688_v6  ;;  %v670_v15 = vld [vmem:[%s880_s1 + $0x60] sm:$0xff]  ;;  %v669_v19 = vld [vmem:[%s880_s1 + $0x58] sm:$0xff]  ;;  %v668_v23 = vld [vmem:[%s880_s1 + $0x50] sm:$0xff] }
   0x9   :  { %389 = vmatpush.bf16.msra.mxu1 %v672_v7  ;;  %v659_v24 = vld [vmem:[%s880_s1 + $0x8] sm:$0xff]  ;;  %v658_v28 = vld [vmem:[%s880_s1] sm:$0xff]  ;;  %v697_v30 = vld [vmem:[%s880_s1 + $0x138] sm:$0xff] }
   0xa   :  { %376 = vmatpush.bf16.msra.mxu0 %v663_v8  ;;  %v675_v25 = vld [vmem:[%s880_s1 + $0x88] sm:$0xff]  ;;  %v674_v29 = vld [vmem:[%s880_s1 + $0x80] sm:$0xff]  ;;  %v656_v32 = vld [vmem:[%s881_s0 + $0x18] sm:$0xf0] }
   0xb   :  { %404 = vmatpush.bf16.msra.mxu2 %v679_v9  ;;  %v683_v26 = vld [vmem:[%s880_s1 + $0xc8] sm:$0xff]  ;;  %v475_v33 = vld [vmem:[%s881_s0] sm:$0xf]  ;;  %v655_v34 = vld [vmem:[%s881_s0 + $0x10] sm:$0xf0] }
   0xc   :  { %418 = vmatpush.bf16.msra.mxu3 %v687_v10  ;;  %v667_v27 = vld [vmem:[%s880_s1 + $0x48] sm:$0xff]  ;;  %v682_v35 = vld [vmem:[%s880_s1 + $0xc0] sm:$0xff]  ;;  %v477_v40 = vld [vmem:[%s881_s0 + $0x14] sm:$0xf0]  ;;  %v476_v42 = vor.u32 %v655_v34, %v475_v33 }
   0xd   :  { %390 = vmatpush.bf16.msra.mxu1 %v671_v11  ;;  %v483_v31 = vld [vmem:[%s881_s0 + $0x8] sm:$0xf]  ;;  %v654_v36 = vld [vmem:[%s881_s0 + $0xc] sm:$0xf]  ;;  %v485_v37 = vld [vmem:[%s881_s0 + $0x1c] sm:$0xf0] }
   0xe   :  { %377 = vmatpush.bf16.msra.mxu0 %v662_v12  ;;  %v666_v38 = vld [vmem:[%s880_s1 + $0x40] sm:$0xff]  ;;  %v484_v41 = vor.u32 %v656_v32, %v483_v31  ;;  %v488_v43 = vor.u32 %v654_v36, %v485_v37  ;;  %v696_v44 = vld [vmem:[%s880_s1 + $0x130] sm:$0xff]  ;;  %v695_v46 = vld [vmem:[%s880_s1 + $0x128] sm:$0xff] }
   0xf   :  { %405 = vmatpush.bf16.msra.mxu2 %v678_v13  ;;  %v653_v39 = vld [vmem:[%s881_s0 + $0x4] sm:$0xf]  ;;  %v693_v48 = vld [vmem:[%s880_s1 + $0x118] sm:$0xff]  ;;  %v692_v49 = vld [vmem:[%s880_s1 + $0x110] sm:$0xff] }
  0x10   :  { %419 = vmatpush.bf16.msra.mxu3 %v686_v14  ;;  %v480_v45 = vor.u32 %v653_v39, %v477_v40  ;;  %v694_v47 = vld [vmem:[%s880_s1 + $0x120] sm:$0xff]  ;;  %v691_v50 = vld [vmem:[%s880_s1 + $0x108] sm:$0xff]  ;;  %v491_v52 = vld [vmem:[%s881_s0 + $0x10] sm:$0xf] }
  0x11   :  { %391 = vmatpush.bf16.msra.mxu1 %v670_v15  ;;  %v690_v51 = vld [vmem:[%s880_s1 + $0x100] sm:$0xff] }
  0x12   :  { %378 = vmatpush.bf16.msra.mxu0 %v661_v16  ;;  %v657_v53 = vld [vmem:[%s881_s0 + $0x20] sm:$0xf0]  ;;  %v703_v5 = vld [vmem:[%s882_s2] ss:$0 sm:$0xff] }
  0x13   :  { %406 = vmatpush.bf16.msra.mxu2 %v677_v17  ;;  %v492_v54 = vor.u32 %v657_v53, %v491_v52 }
  0x14   :  { %420 = vmatpush.bf16.msra.mxu3 %v685_v18 }
  0x15   :  { %392 = vmatpush.bf16.msra.mxu1 %v669_v19 }
  0x16   :  { %379 = vmatpush.bf16.msra.mxu0 %v660_v20 }
  0x17   :  { %407 = vmatpush.bf16.msra.mxu2 %v676_v21 }
  0x18   :  { %421 = vmatpush.bf16.msra.mxu3 %v684_v22 }
  0x19   :  { %393 = vmatpush.bf16.msra.mxu1 %v668_v23 }
  0x1a   :  { %380 = vmatpush.bf16.msra.mxu0 %v659_v24 }
  0x1b   :  { %408 = vmatpush.bf16.msra.mxu2 %v675_v25 }
  0x1c   :  { %422 = vmatpush.bf16.msra.mxu3 %v683_v26 }
  0x1d   :  { %394 = vmatpush.bf16.msra.mxu1 %v667_v27 }
  0x1e   :  { %381 = vmatpush.bf16.msra.mxu0 %v658_v28 }
  0x1f   :  { %409 = vmatpush.bf16.msra.mxu2 %v674_v29 }
  0x20   :  { %423 = vmatpush.bf16.msra.mxu3 %v682_v35 }
  0x21   :  { %395 = vmatpush.bf16.msra.mxu1 %v666_v38  ;;  %382 = vmatmul.bf16.vlgmr.msra.gmra.mxu0 %v476_v42 }
  0x22   :  { %430 = vmatpush.bf16.msrb.mxu0 %v697_v30  ;;  %410 = vmatmul.bf16.vlgmr.msra.gmra.mxu2 %v484_v41 }
  0x23   :  { %424 = vmatmul.bf16.vlgmr.msra.gmra.mxu3 %v488_v43 }
  0x24   :  { %396 = vmatmul.bf16.vlgmr.msra.gmra.mxu1 %v480_v45 }
  0x26   :  { %431 = vmatpush.bf16.msrb.mxu0 %v696_v44 }
  0x2a   :  { %432 = vmatpush.bf16.msrb.mxu0 %v695_v46 }
  0x2e   :  { %433 = vmatpush.bf16.msrb.mxu0 %v694_v47 }
  0x32   :  { %434 = vmatpush.bf16.msrb.mxu0 %v693_v48 }
  0x36   :  { %435 = vmatpush.bf16.msrb.mxu0 %v692_v49 }
  0x3a   :  { %436 = vmatpush.bf16.msrb.mxu0 %v691_v50 }
  0x3e   :  { %437 = vmatpush.bf16.msrb.mxu0 %v690_v51 }
  0x41   :  { %438 = vmatmul.bf16.vlgmr.msrb.gmra.mxu0 %v492_v54 }
  0x9e   :  { %v383_v55 = vpop.f32.mrf.mxu0 }
  0xa1   :  { %v397_v56 = vpop.f32.mrf.mxu1 }
  0xa2   :  { %v398_v59 = vadd.f32 %v397_v56, %v383_v55 }
  0xa5   :  { %v411_v57 = vpop.f32.mrf.mxu2 }
  0xa6   :  { %v385_v58 = vpop.f32.mrf.mxu0  ;;  %v425_v60 = vpop.f32.mrf.mxu3  ;;  %v412_v62 = vadd.f32 %v411_v57, %v398_v59 }
  0xa8   :  { %v426_v2 = vadd.f32 %v425_v60, %v412_v62 }
  0xa9   :  { %v399_v61 = vpop.f32.mrf.mxu1 }
  0xaa   :  { %v400_v63 = vadd.f32 %v399_v61, %v385_v58 }
  0xad   :  { %v413_v0 = vpop.f32.mrf.mxu2 }
  0xae   :  { %v414_v3 = vadd.f32 %v413_v0, %v400_v63  ;;  %v427_v6 = vpop.f32.mrf.mxu3 }
  0xb0   :  { %v428_v7 = vadd.f32 %v427_v6, %v414_v3 }
  0xbe   :  { %v439_v1 = vpop.f32.mrf.mxu0 }
  0xbf   :  { %v440_v4 = vadd.f32 %v439_v1, %v426_v2 }
  0xc1   :  { %v457_v8 = vadd.f32 %v703_v5, %v440_v4 }
  0xc3   :  { %v461_v11 = vmul.f32 0.1, %v457_v8  ;;  %vm459_vm0 = vcmp.ge.f32.partialorder %v457_v8, 0.0 }
  0xc5   :  { %v463_v14 = vsel %vm459_vm0, %v457_v8, %v461_v11 }
  0xc6   :  { %v441_v9 = vpop.f32.mrf.mxu0 }
  0xc7   :  { %v442_v10 = vadd.f32 %v441_v9, %v428_v7 }
  0xc9   :  { %v458_v12 = vadd.f32 %v703_v5, %v442_v10 }
  0xcb   :  { %vm460_vm1 = vcmp.ge.f32.partialorder %v458_v12, 0.0  ;;  %v462_v13 = vmul.f32 0.1, %v458_v12 }
  0xcd   :  { %v464_v15 = vsel %vm460_vm1, %v458_v12, %v462_v13 }
  0xce   :  { %v701_v16 = vpack.c.bf16 %v464_v15, %v463_v14 }
  0xd0   :  { %702 = vst [vmem:[%s883_s3] sm:$0xff] %v701_v16  }

// kernel: _lambda_.13
= control target key start
LH: loop header
LB: loop body
LE: loop exit
PB: predicated region body
PF: predicated region fallthrough
CT: control target
= control target key end

     0   :  { %s543_s12 = smov 0   ;;  %s545_s13 = smov 0   ;;  %s585_s0 = inlined_call_operand.vmem [shape: bf16[32,20], index: 0, kind: input, shape index: {}]   ;;  %s586_s1 = inlined_call_operand.vmem [shape: bf16[20,128], index: 1, kind: input, shape index: {}]   ;;  %s587_s2 = inlined_call_operand.vmem [shape: f32[1,128], index: 2, kind: input, shape index: {}]   ;;  %s588_s3 = inlined_call_operand.vmem [shape: bf16[32,128], index: 3, kind: output, shape index: {}]  }
   0x1   :  { %s547_s14 = smov 0  }
   0x2 LB: > { %s32_s15 = sadd.s32 1, %s517_s13  ;;  %p451_p0 = scmp.ge.s32.totalorder %s521_s14, 1  ;;  %s521_s14 = sphi %s547_s14, %s13_s14   ;;  %s517_s13 = sphi %s545_s13, %s590_s13   ;;  %s513_s12 = sphi %s543_s12, %s589_s12  }
   0x3   : > { %p34_p1 = scmp.ge.s32.totalorder %s32_s15, 2  ;;  %p188_p2 = scmp.lt.s32.totalorder %s521_s14, 3 }
   0x5   : > { %s592_s15 = smov (%p34_p1, %s32_s15), 0  ;;  %p189_p3 = pnand %p451_p0, %p188_p2 }
   0x6   : > { %s452_s18 = sshll.u32 (!%p189_p3), %s513_s12, 1 }
   0x7   : > { %192 = sbr.rel (%p189_p3) target bundleno = 167 (0xa7), region = 32  ;;  %p230_p4 = scmp.lt.s32.totalorder (!%p189_p3), %s452_s18, 3 }
   0xc   : > { %v272_v0 = vld [vmem:[%s586_s1 + $0x8] sm:$0x3]  ;;  %vm291_vm0 = vcmask 1041408   ;;  %s594_s18 = smov (!%p230_p4, %s452_s18), 3  ;;  %v468_v4 = vld [vmem:[%s586_s1] sm:$0xff]  ;;  %vm287_vm1 = vcmask 162816  }
   0xd   : > { %v283_v1 = vunpack.c.l.b16 %v272_v0  ;;  %s453_s19 = sshll.u32 %s594_s18, 2  ;;  %v498_v7 = vld [vmem:[%s587_s2] ss:$0 sm:$0xff] }
   0xe   : > { %s236_s24 = scalar_lea.vmem %s585_s0, %s453_s19  ;;  %s257_s29 = scalar_lea.vmem %s588_s3, %s453_s19 }
   0xf   : > { %v285_v2 = vpack.c.b16 %v283_v1, %v283_v1  ;;  %v467_v5 = vld [vmem:[%s236_s24] sm:$0xff] }
  0x11   : > { %v293_v3 = vsel %vm291_vm0, %v285_v2, 0 }
  0x12   : > { %301 = vmatpush.bf16.msra.mxu0 %v293_v3 }
  0x16   : > { %302 = vmatpush.bf16.msra.mxu0 %v468_v4 }
  0x19   : > { %464 = vmatmul.msk.bf16.vlgmr.msra.gmra.mxu0 %vm287_vm1, %v467_v5 }
  0x96   : > { %v304_v6 = vpop.f32.mrf.mxu0 }
  0x97   : > { %v322_v8 = vadd.f32 %v498_v7, %v304_v6 }
  0x99   : > { %v326_v10 = vmul.f32 0.1, %v322_v8  ;;  %vm324_vm2 = vcmp.ge.f32.partialorder %v322_v8, 0.0 }
  0x9b   : > { %v328_v13 = vsel %vm324_vm2, %v322_v8, %v326_v10 }
  0x9e   : > { %v306_v9 = vpop.f32.mrf.mxu0 }
  0x9f   : > { %v323_v11 = vadd.f32 %v498_v7, %v306_v9 }
  0xa1   : > { %vm325_vm3 = vcmp.ge.f32.partialorder %v323_v11, 0.0  ;;  %v327_v12 = vmul.f32 0.1, %v323_v11 }
  0xa3   : > { %v329_v14 = vsel %vm325_vm3, %v323_v11, %v327_v12 }
  0xa4   : > { %v472_v15 = vpack.c.bf16 %v329_v14, %v328_v13 }
  0xa6   : > { %473 = vst [vmem:[%s257_s29] sm:$0xff] %v472_v15  }
  0xa7 PF: > { %s13_s14 = sadd.s32 1, %s521_s14   ;;  %s589_s12 = smov %s517_s13 }
  0xa8   : > { %p10_p5 = scmp.ge.s32.totalorder %s13_s14, 4   ;;  %s590_s13 = smov %s592_s15 }
  0xaa   :  { %12 = sbr.rel (!%p10_p5) target bundleno = 2 (0x2), region = 76 }

</bundles_post_ra>
